<compile_context>
chip_gen: v7x
topology: tpu7x:2x2x1
jax: 0.10.0
libtpu: 0.0.40
codegen_flags: <defaults>
</compile_context>

<pallas_src>
import functools

import numpy as np
import jax
import jax.numpy as jnp
from jax.experimental import pallas as pl
from jax.experimental.pallas import tpu as pltpu


def _round_up(x, m):
    return ((x + m - 1) // m) * m


# ----------------------------------------------------------------------------
# Kernel 1: direct 3x3 conv (pad=1; stride 1 or 2; optional fused 2x upsample)
# as 3 banded MXU dots.  Per grid step (bb images):
#   x_ref : (bb, n_ph, Hrows, W_in*Cin)  rows-only-padded input (bf16);
#           stride 2 uses two row-parity planes so slices stay unit stride.
#   w_ref : (3, W_in*Cin, Wo*Cout)       banded per-dy weights (bf16)
#   b_ref : (1, Wo*Cout)                 bias tiled across output columns (f32)
#   o_ref : (bb, Ho, Wo*Cout)            lane-dense output slab
# ----------------------------------------------------------------------------
def _conv3x3_kernel(x_ref, w_ref, b_ref, o_ref, *, stride, ho, act):
    bb, _, _, kdim = x_ref.shape
    nout = o_ref.shape[-1]
    xall = x_ref[...]                                    # whole (small) block
    acc = jnp.zeros((bb * ho, nout), jnp.float32)
    for dy in range(3):                                  # 3 banded dots
        if stride == 1:
            rows = xall[:, 0, dy:dy + ho, :]
        else:                                            # row-parity planes
            rows = xall[:, dy % 2, dy // 2:dy // 2 + ho, :]
        rows = rows.reshape(bb * ho, kdim)               # M = bb*Ho for the MXU
        acc = acc + jnp.dot(rows, w_ref[dy],
                            preferred_element_type=jnp.float32)
    acc = acc + b_ref[...]                               # broadcast over rows
    if act == "relu":
        acc = jnp.maximum(acc, 0.0)
    elif act == "sigmoid":
        acc = 1.0 / (1.0 + jnp.exp(-acc))                # exact (final layer)
    o_ref[...] = acc.reshape(bb, ho, nout).astype(o_ref.dtype)


def _prep_conv(w_oihw, b, *, w_in, stride=1, up=1):
    """One-time host-side packing of a 3x3 conv (pad=1) into banded weights.

    Wband[dy] : (w_in*Cin, Wo*Cout).  Output col j, tap dx reads column
    u = j*stride + dx - 1 of the (optionally 2x-width-upsampled) padded image;
    in-range u maps to source col u // up, out-of-range taps vanish (zero
    pad).  Horizontal pad, column stride and the width half of the 2x
    upsample are therefore all absorbed into the weights."""
    w = np.asarray(jax.device_get(w_oihw), np.float32)   # [Cout, Cin, 3, 3]
    bias = np.asarray(jax.device_get(b), np.float32)
    cout, cin = w.shape[0], w.shape[1]
    w_up = w_in * up
    wo = w_up // stride
    band = np.zeros((3, w_in * cin, wo * cout), np.float32)
    for dy in range(3):
        for j in range(wo):
            for dx in range(3):
                u = j * stride + dx - 1
                if 0 <= u < w_up:
                    s = u // up
                    band[dy, s * cin:(s + 1) * cin,
                         j * cout:(j + 1) * cout] += w[:, :, dy, dx].T
    return {"w": jnp.asarray(band, jnp.bfloat16),
            "b": jnp.asarray(np.tile(bias, wo)[None, :], jnp.float32),
            "cout": cout, "stride": stride, "up": up}


def conv3x3(x_nhwc, packed, act="relu", out_dtype=jnp.bfloat16):
    """3x3 conv, pad=1, stride in {1,2}, optional fused nearest-2x upsample."""
    B, H, W, Cin = x_nhwc.shape
    stride, up, Cout = packed["stride"], packed["up"], packed["cout"]
    Heff = H * up
    Ho, Wo = Heff // stride, (W * up) // stride
    Kdim, Nout = W * Cin, Wo * Cout

    x = x_nhwc.reshape(B, H, W * Cin).astype(jnp.bfloat16)
    if up == 2:
        # Height half of the fused nearest-2x upsample (width half lives in
        # the banded weights): 2x intermediate in HBM instead of 4x.
        x = jnp.broadcast_to(x[:, :, None, :],
                             (B, H, 2, Kdim)).reshape(B, Heff, Kdim)
    xp = jnp.pad(x, ((0, 0), (1, 1), (0, 0)))            # rows-only halo
    if stride == 1:
        planes = xp[:, None]                             # (B, 1, Heff+2, K)
    else:
        # Row-parity planes -> all in-kernel row slices are unit stride.
        planes = jnp.stack([xp[:, 0::2, :], xp[:, 1::2, :]], axis=1)
    n_ph, Hrows = planes.shape[1], planes.shape[2]

    bb = max(1, min(B, 128 // max(Ho, 1)))               # ~128 MXU rows/step
    Bp = _round_up(B, bb)
    if Bp != B:
        planes = jnp.pad(planes, ((0, Bp - B), (0, 0), (0, 0), (0, 0)))

    o_bytes = np.dtype(out_dtype).itemsize
    x_blk = bb * n_ph * Hrows * Kdim * 2
    w_blk = 3 * Kdim * Nout * 2
    o_blk = bb * Ho * Nout * o_bytes
    needed = 2 * (x_blk + w_blk + Nout * 4) + 2 * o_blk
    vmem_limit = int(min(64 << 20, max(8 << 20, 4 * needed)))

    cost = pl.CostEstimate(
        flops=int(2 * Bp * 3 * Ho * Kdim * Nout),
        transcendentals=int(Bp * Ho * Nout) if act == "sigmoid" else 0,
        bytes_accessed=int(planes.size * 2 + 3 * Kdim * Nout * 2 + Nout * 4
                           + Bp * Ho * Nout * o_bytes))

    out = pl.pallas_call(
        functools.partial(_conv3x3_kernel, stride=stride, ho=Ho, act=act),
        out_shape=jax.ShapeDtypeStruct((Bp, Ho, Nout), out_dtype),
        grid_spec=pltpu.PrefetchScalarGridSpec(
            num_scalar_prefetch=0,
            grid=(Bp // bb,),
            in_specs=[
                pl.BlockSpec((bb, n_ph, Hrows, Kdim), lambda bi: (bi, 0, 0, 0)),
                pl.BlockSpec((3, Kdim, Nout), lambda bi: (0, 0, 0)),
                pl.BlockSpec((1, Nout), lambda bi: (0, 0)),
            ],
            out_specs=pl.BlockSpec((bb, Ho, Nout), lambda bi: (bi, 0, 0)),
        ),
        compiler_params=pltpu.CompilerParams(
            dimension_semantics=("parallel",),
            vmem_limit_bytes=vmem_limit),
        cost_estimate=cost,
    )(planes, packed["w"], packed["b"])
    return out[:B].reshape(B, Ho, Wo, Cout)


# ----------------------------------------------------------------------------
# Kernel 2: fused linear  out = act(x @ w + b), M/N/K tiled with f32 VMEM
# accumulator; K is the reduction ("arbitrary") axis.  Weights/bias are padded
# once in prepare_params so every store is lane-dense.
# ----------------------------------------------------------------------------
def _linear_kernel(x_ref, w_ref, b_ref, o_ref, acc_ref, *, act):
    @pl.when(pl.program_id(2) == 0)
    def _():
        acc_ref[...] = jnp.zeros_like(acc_ref)

    acc_ref[...] += jnp.dot(x_ref[...], w_ref[...],
                            preferred_element_type=jnp.float32)

    @pl.when(pl.program_id(2) == pl.num_programs(2) - 1)
    def _():
        acc = acc_ref[...] + b_ref[...]
        if act == "relu":
            acc = jnp.maximum(acc, 0.0)
        elif act == "sigmoid":
            acc = 1.0 / (1.0 + jnp.exp(-acc))
        o_ref[...] = acc.astype(o_ref.dtype)


def _prep_linear(w, b):
    """One-time host-side packing: bf16 weights padded to (Kp, Np) tiles."""
    K, N = w.shape
    tk = min(512, _round_up(K, 128))
    Kp = _round_up(K, tk)
    n128 = _round_up(N, 128)
    tn = 256 if n128 % 256 == 0 else 128      # v6e/v7x: prefer 256-wide tiles
    Np = _round_up(N, tn)
    w_np = np.asarray(jax.device_get(w), np.float32)
    b_np = np.asarray(jax.device_get(b), np.float32)
    w_p = np.zeros((Kp, Np), np.float32)
    w_p[:K, :N] = w_np
    b_p = np.zeros((1, Np), np.float32)
    b_p[0, :N] = b_np
    return {"w": jnp.asarray(w_p, jnp.bfloat16),
            "b": jnp.asarray(b_p, jnp.float32),
            "k": K, "n": N, "tk": tk, "tn": tn}


def linear(x, packed, act="none", out_dtype=jnp.bfloat16, tm_max=256):
    M, K = x.shape
    w_p, b_p = packed["w"], packed["b"]
    Kp, Np = w_p.shape
    N, tk, tn = packed["n"], packed["tk"], packed["tn"]
    tm = min(tm_max, _round_up(M, 8))
    Mp = _round_up(M, tm)
    x_p = jnp.pad(x.astype(jnp.bfloat16), ((0, Mp - M), (0, Kp - K)))

    o_bytes = np.dtype(out_dtype).itemsize
    needed = (2 * (tm * tk * 2 + tk * tn * 2 + tn * 4)
              + 2 * tm * tn * o_bytes + tm * tn * 4)
    vmem_limit = int(min(64 << 20, max(8 << 20, 4 * needed)))
    cost = pl.CostEstimate(
        flops=int(2 * Mp * Kp * Np),
        transcendentals=int(Mp * Np) if act == "sigmoid" else 0,
        bytes_accessed=int(Mp * Kp * 2 + Kp * Np * 2 + Np * 4 + Mp * Np * o_bytes))

    out = pl.pallas_call(
        functools.partial(_linear_kernel, act=act),
        out_shape=jax.ShapeDtypeStruct((Mp, Np), out_dtype),
        grid_spec=pltpu.PrefetchScalarGridSpec(
            num_scalar_prefetch=0,
            grid=(Mp // tm, Np // tn, Kp // tk),
            in_specs=[
                pl.BlockSpec((tm, tk), lambda mi, ni, ki: (mi, ki)),
                pl.BlockSpec((tk, tn), lambda mi, ni, ki: (ki, ni)),
                pl.BlockSpec((1, tn), lambda mi, ni, ki: (0, ni)),
            ],
            out_specs=pl.BlockSpec((tm, tn), lambda mi, ni, ki: (mi, ni)),
            scratch_shapes=[pltpu.VMEM((tm, tn), jnp.float32)],
        ),
        compiler_params=pltpu.CompilerParams(
            dimension_semantics=("parallel", "parallel", "arbitrary"),
            vmem_limit_bytes=vmem_limit),
        cost_estimate=cost,
    )(x_p, w_p, b_p)
    return out[:M, :N]


# ----------------------------------------------------------------------------
# Deterministic parameter init (PyTorch-layout raw params) + one-time packing.
# ----------------------------------------------------------------------------
def init_params(key, in_ch, H, W, attr_dim=32):
    Hq, Wq = H // 4, W // 4
    flat = 16 * Hq * Wq
    ks = jax.random.split(key, 12)

    def conv_w(k, cout, cin):
        fan = cin * 9
        return jax.random.normal(k, (cout, cin, 3, 3), jnp.float32) / jnp.sqrt(fan)

    def fc_w(k, kin, kout):
        return jax.random.normal(k, (kin, kout), jnp.float32) / jnp.sqrt(kin)

    return {
        "enc_conv1_w": conv_w(ks[0], 8, in_ch),
        "enc_conv1_b": jnp.zeros((8,), jnp.float32),
        "enc_conv2_w": conv_w(ks[1], 16, 8),
        "enc_conv2_b": jnp.zeros((16,), jnp.float32),
        "enc_fc_w": fc_w(ks[2], flat, attr_dim),
        "enc_fc_b": jnp.zeros((attr_dim,), jnp.float32),
        "dec_fc_w": fc_w(ks[3], attr_dim, flat),
        "dec_fc_b": jnp.zeros((flat,), jnp.float32),
        "dec_conv1_w": conv_w(ks[4], 8, 16),
        "dec_conv1_b": jnp.zeros((8,), jnp.float32),
        "dec_conv2_w": conv_w(ks[5], in_ch, 8),
        "dec_conv2_b": jnp.zeros((in_ch,), jnp.float32),
    }


def prepare_params(params, in_ch, H, W):
    """One-time weight packing (hoisted out of the per-forward path)."""
    del in_ch
    return {
        "enc_conv1": _prep_conv(params["enc_conv1_w"], params["enc_conv1_b"],
                                w_in=W, stride=2, up=1),
        "enc_conv2": _prep_conv(params["enc_conv2_w"], params["enc_conv2_b"],
                                w_in=W // 2, stride=2, up=1),
        "enc_fc": _prep_linear(params["enc_fc_w"], params["enc_fc_b"]),
        "dec_fc": _prep_linear(params["dec_fc_w"], params["dec_fc_b"]),
        "dec_conv1": _prep_conv(params["dec_conv1_w"], params["dec_conv1_b"],
                                w_in=W // 4, stride=1, up=2),   # fused up2x
        "dec_conv2": _prep_conv(params["dec_conv2_w"], params["dec_conv2_b"],
                                w_in=W // 2, stride=1, up=2),   # fused up2x
    }


# ----------------------------------------------------------------------------
# RepairNet forward = AttrEncoder -> AttrDecoder.
# ----------------------------------------------------------------------------
def repair_net(prepped, imgs_nchw):
    B, C, H, W = imgs_nchw.shape
    x = jnp.transpose(imgs_nchw, (0, 2, 3, 1))                    # NCHW->NHWC

    # ----- AttrEncoder -----
    x = conv3x3(x, prepped["enc_conv1"], act="relu")
    x = conv3x3(x, prepped["enc_conv2"], act="relu")
    # NHWC flatten (self-consistent with the synthetic init).
    # TODO(synk): a PyTorch checkpoint flattens NCHW; permute FC weights when
    #             porting real weights.
    x = x.reshape(B, -1)
    attrs = linear(x, prepped["enc_fc"], act="none")

    # ----- AttrDecoder -----
    h = linear(attrs, prepped["dec_fc"], act="relu")
    h = h.reshape(B, H // 4, W // 4, 16)
    h = conv3x3(h, prepped["dec_conv1"], act="relu")               # fused up2x
    h = conv3x3(h, prepped["dec_conv2"], act="sigmoid",
                out_dtype=jnp.float32)                             # fused up2x
    return jnp.transpose(h, (0, 3, 1, 2))                          # NHWC->NCHW


if __name__ == "__main__":
    key = jax.random.PRNGKey(0)
    k_img, k_par = jax.random.split(key)

    B, C, H, W = 2, 4, 16, 16
    imgs = jax.random.normal(k_img, (B, C, H, W), jnp.float32)
    params = init_params(k_par, C, H, W, attr_dim=32)
    prepped = prepare_params(params, C, H, W)       # one-time weight packing

    fwd = jax.jit(lambda im: repair_net(prepped, im))
    outs = fwd(imgs)
    jax.block_until_ready(outs)

    assert outs.shape == (B, C, H, W), outs.shape
    assert bool(jnp.all(jnp.isfinite(outs)))
    print("KERNEL_OK")
</pallas_src>

<mosaic_0001>
module attributes {stable_mosaic.version = 11 : i64} {
  func.func @_conv3x3_kernel(%arg0: i32, %arg1: memref<2x2x9x64xbf16, #tpu.memory_space<vmem>>, %arg2: memref<3x64x64xbf16, #tpu.memory_space<vmem>>, %arg3: memref<1x64xf32, #tpu.memory_space<vmem>>, %arg4: memref<2x8x64xbf16, #tpu.memory_space<vmem>>) attributes {dimension_semantics = [#tpu.dimension_semantics<parallel>], iteration_bounds = array<i64: 1>, scalar_prefetch = 0 : i64, scratch_operands = 0 : i64, tpu.core_type = #tpu.core_type<tc>, window_params = [{transform_indices = @transform_0, window_bounds = array<i64: 2, 2, 9, 64>}, {pipeline_mode = #tpu.pipeline_mode<synchronous>, transform_indices = @transform_1, window_bounds = array<i64: 3, 64, 64>}, {pipeline_mode = #tpu.pipeline_mode<synchronous>, transform_indices = @transform_2, window_bounds = array<i64: 1, 64>}, {transform_indices = @transform_3, window_bounds = array<i64: 2, 8, 64>}]} {
    %c0 = arith.constant 0 : index
    %c0_0 = arith.constant 0 : index
    %c0_1 = arith.constant 0 : index
    %c0_2 = arith.constant 0 : index
    %0 = vector.load %arg1[%c0, %c0_0, %c0_1, %c0_2] : memref<2x2x9x64xbf16, #tpu.memory_space<vmem>>, vector<2x2x9x64xbf16>
    %cst = arith.constant 0.000000e+00 : f32
    %1 = vector.broadcast %cst : f32 to vector<16x64xf32>
    %2 = vector.extract_strided_slice %0 {offsets = [0, 0, 0, 0], sizes = [2, 1, 8, 64], strides = [1, 1, 1, 1]} : vector<2x2x9x64xbf16> to vector<2x1x8x64xbf16>
    %3 = vector.shape_cast %2 : vector<2x1x8x64xbf16> to vector<2x8x64xbf16>
    %4 = vector.shape_cast %3 : vector<2x8x64xbf16> to vector<16x64xbf16>
    %c0_3 = arith.constant 0 : index
    %c0_4 = arith.constant 0 : index
    %c0_5 = arith.constant 0 : index
    %5 = vector.load %arg2[%c0_3, %c0_4, %c0_5] : memref<3x64x64xbf16, #tpu.memory_space<vmem>>, vector<1x64x64xbf16>
    %6 = vector.shape_cast %5 : vector<1x64x64xbf16> to vector<64x64xbf16>
    %cst_6 = arith.constant dense<0.000000e+00> : vector<16x64xf32>
    %7 = tpu.matmul %4, %6, %cst_6 {dimension_numbers = #tpu.dot_dimension_numbers<[1], [0], [0], [1], [0, 0, 1, 1], [], []>} : vector<16x64xbf16>, vector<64x64xbf16>, vector<16x64xf32> -> vector<16x64xf32>
    %8 = arith.addf %1, %7 : vector<16x64xf32>
    %9 = vector.extract_strided_slice %0 {offsets = [0, 1, 0, 0], sizes = [2, 1, 8, 64], strides = [1, 1, 1, 1]} : vector<2x2x9x64xbf16> to vector<2x1x8x64xbf16>
    %10 = vector.shape_cast %9 : vector<2x1x8x64xbf16> to vector<2x8x64xbf16>
    %11 = vector.shape_cast %10 : vector<2x8x64xbf16> to vector<16x64xbf16>
    %c1 = arith.constant 1 : index
    %c0_7 = arith.constant 0 : index
    %c0_8 = arith.constant 0 : index
    %12 = vector.load %arg2[%c1, %c0_7, %c0_8] : memref<3x64x64xbf16, #tpu.memory_space<vmem>>, vector<1x64x64xbf16>
    %13 = vector.shape_cast %12 : vector<1x64x64xbf16> to vector<64x64xbf16>
    %cst_9 = arith.constant dense<0.000000e+00> : vector<16x64xf32>
    %14 = tpu.matmul %11, %13, %cst_9 {dimension_numbers = #tpu.dot_dimension_numbers<[1], [0], [0], [1], [0, 0, 1, 1], [], []>} : vector<16x64xbf16>, vector<64x64xbf16>, vector<16x64xf32> -> vector<16x64xf32>
    %15 = arith.addf %8, %14 : vector<16x64xf32>
    %16 = vector.extract_strided_slice %0 {offsets = [0, 0, 1, 0], sizes = [2, 1, 8, 64], strides = [1, 1, 1, 1]} : vector<2x2x9x64xbf16> to vector<2x1x8x64xbf16>
    %17 = vector.shape_cast %16 : vector<2x1x8x64xbf16> to vector<2x8x64xbf16>
    %18 = vector.shape_cast %17 : vector<2x8x64xbf16> to vector<16x64xbf16>
    %c2 = arith.constant 2 : index
    %c0_10 = arith.constant 0 : index
    %c0_11 = arith.constant 0 : index
    %19 = vector.load %arg2[%c2, %c0_10, %c0_11] : memref<3x64x64xbf16, #tpu.memory_space<vmem>>, vector<1x64x64xbf16>
    %20 = vector.shape_cast %19 : vector<1x64x64xbf16> to vector<64x64xbf16>
    %cst_12 = arith.constant dense<0.000000e+00> : vector<16x64xf32>
    %21 = tpu.matmul %18, %20, %cst_12 {dimension_numbers = #tpu.dot_dimension_numbers<[1], [0], [0], [1], [0, 0, 1, 1], [], []>} : vector<16x64xbf16>, vector<64x64xbf16>, vector<16x64xf32> -> vector<16x64xf32>
    %22 = arith.addf %15, %21 : vector<16x64xf32>
    %c0_13 = arith.constant 0 : index
    %c0_14 = arith.constant 0 : index
    %23 = vector.load %arg3[%c0_13, %c0_14] : memref<1x64xf32, #tpu.memory_space<vmem>>, vector<1x64xf32>
    %24 = vector.broadcast %23 : vector<1x64xf32> to vector<16x64xf32>
    %25 = arith.addf %22, %24 : vector<16x64xf32>
    %cst_15 = arith.constant 0.000000e+00 : f32
    %26 = vector.broadcast %cst_15 : f32 to vector<16x64xf32>
    %27 = arith.maximumf %25, %26 : vector<16x64xf32>
    %28 = vector.shape_cast %27 : vector<16x64xf32> to vector<2x8x64xf32>
    %29 = arith.truncf %28 : vector<2x8x64xf32> to vector<2x8x64xbf16>
    %c0_16 = arith.constant 0 : index
    %c0_17 = arith.constant 0 : index
    %c0_18 = arith.constant 0 : index
    %30 = vector.load %arg4[%c0_16, %c0_17, %c0_18] : memref<2x8x64xbf16, #tpu.memory_space<vmem>>, vector<2x8x64xbf16>
    tpu.vector_store %arg4[%c0_16, %c0_17, %c0_18], %29 {strides = array<i32>} : memref<2x8x64xbf16, #tpu.memory_space<vmem>>, vector<2x8x64xbf16>,
    return
  }
  func.func @transform_0(%arg0: i32) -> (i32, i32, i32, i32) {
    %c0_i32 = arith.constant 0 : i32
    %c0_i32_0 = arith.constant 0 : i32
    %c0_i32_1 = arith.constant 0 : i32
    %c0_i32_2 = arith.constant 0 : i32
    return %arg0, %c0_i32, %c0_i32_0, %c0_i32_1 : i32, i32, i32, i32
  }
  func.func @transform_1(%arg0: i32) -> (i32, i32, i32) {
    %c0_i32 = arith.constant 0 : i32
    %c0_i32_0 = arith.constant 0 : i32
    %c0_i32_1 = arith.constant 0 : i32
    %c0_i32_2 = arith.constant 0 : i32
    return %c0_i32, %c0_i32_0, %c0_i32_1 : i32, i32, i32
  }
  func.func @transform_2(%arg0: i32) -> (i32, i32) {
    %c0_i32 = arith.constant 0 : i32
    %c0_i32_0 = arith.constant 0 : i32
    %c0_i32_1 = arith.constant 0 : i32
    return %c0_i32, %c0_i32_0 : i32, i32
  }
  func.func @transform_3(%arg0: i32) -> (i32, i32, i32) {
    %c0_i32 = arith.constant 0 : i32
    %c0_i32_0 = arith.constant 0 : i32
    %c0_i32_1 = arith.constant 0 : i32
    return %arg0, %c0_i32, %c0_i32_0 : i32, i32, i32
  }
}

module attributes {stable_mosaic.version = 11 : i64} {
  func.func @_conv3x3_kernel(%arg0: i32, %arg1: memref<2x2x5x64xbf16, #tpu.memory_space<vmem>>, %arg2: memref<3x64x64xbf16, #tpu.memory_space<vmem>>, %arg3: memref<1x64xf32, #tpu.memory_space<vmem>>, %arg4: memref<2x4x64xbf16, #tpu.memory_space<vmem>>) attributes {dimension_semantics = [#tpu.dimension_semantics<parallel>], iteration_bounds = array<i64: 1>, scalar_prefetch = 0 : i64, scratch_operands = 0 : i64, tpu.core_type = #tpu.core_type<tc>, window_params = [{transform_indices = @transform_0, window_bounds = array<i64: 2, 2, 5, 64>}, {pipeline_mode = #tpu.pipeline_mode<synchronous>, transform_indices = @transform_1, window_bounds = array<i64: 3, 64, 64>}, {pipeline_mode = #tpu.pipeline_mode<synchronous>, transform_indices = @transform_2, window_bounds = array<i64: 1, 64>}, {transform_indices = @transform_3, window_bounds = array<i64: 2, 4, 64>}]} {
    %c0 = arith.constant 0 : index
    %c0_0 = arith.constant 0 : index
    %c0_1 = arith.constant 0 : index
    %c0_2 = arith.constant 0 : index
    %0 = vector.load %arg1[%c0, %c0_0, %c0_1, %c0_2] : memref<2x2x5x64xbf16, #tpu.memory_space<vmem>>, vector<2x2x5x64xbf16>
    %cst = arith.constant 0.000000e+00 : f32
    %1 = vector.broadcast %cst : f32 to vector<8x64xf32>
    %2 = vector.extract_strided_slice %0 {offsets = [0, 0, 0, 0], sizes = [2, 1, 4, 64], strides = [1, 1, 1, 1]} : vector<2x2x5x64xbf16> to vector<2x1x4x64xbf16>
    %3 = vector.shape_cast %2 : vector<2x1x4x64xbf16> to vector<2x4x64xbf16>
    %4 = vector.shape_cast %3 : vector<2x4x64xbf16> to vector<8x64xbf16>
    %c0_3 = arith.constant 0 : index
    %c0_4 = arith.constant 0 : index
    %c0_5 = arith.constant 0 : index
    %5 = vector.load %arg2[%c0_3, %c0_4, %c0_5] : memref<3x64x64xbf16, #tpu.memory_space<vmem>>, vector<1x64x64xbf16>
    %6 = vector.shape_cast %5 : vector<1x64x64xbf16> to vector<64x64xbf16>
    %cst_6 = arith.constant dense<0.000000e+00> : vector<8x64xf32>
    %7 = tpu.matmul %4, %6, %cst_6 {dimension_numbers = #tpu.dot_dimension_numbers<[1], [0], [0], [1], [0, 0, 1, 1], [], []>} : vector<8x64xbf16>, vector<64x64xbf16>, vector<8x64xf32> -> vector<8x64xf32>
    %8 = arith.addf %1, %7 : vector<8x64xf32>
    %9 = vector.extract_strided_slice %0 {offsets = [0, 1, 0, 0], sizes = [2, 1, 4, 64], strides = [1, 1, 1, 1]} : vector<2x2x5x64xbf16> to vector<2x1x4x64xbf16>
    %10 = vector.shape_cast %9 : vector<2x1x4x64xbf16> to vector<2x4x64xbf16>
    %11 = vector.shape_cast %10 : vector<2x4x64xbf16> to vector<8x64xbf16>
    %c1 = arith.constant 1 : index
    %c0_7 = arith.constant 0 : index
    %c0_8 = arith.constant 0 : index
    %12 = vector.load %arg2[%c1, %c0_7, %c0_8] : memref<3x64x64xbf16, #tpu.memory_space<vmem>>, vector<1x64x64xbf16>
    %13 = vector.shape_cast %12 : vector<1x64x64xbf16> to vector<64x64xbf16>
    %cst_9 = arith.constant dense<0.000000e+00> : vector<8x64xf32>
    %14 = tpu.matmul %11, %13, %cst_9 {dimension_numbers = #tpu.dot_dimension_numbers<[1], [0], [0], [1], [0, 0, 1, 1], [], []>} : vector<8x64xbf16>, vector<64x64xbf16>, vector<8x64xf32> -> vector<8x64xf32>
    %15 = arith.addf %8, %14 : vector<8x64xf32>
    %16 = vector.extract_strided_slice %0 {offsets = [0, 0, 1, 0], sizes = [2, 1, 4, 64], strides = [1, 1, 1, 1]} : vector<2x2x5x64xbf16> to vector<2x1x4x64xbf16>
    %17 = vector.shape_cast %16 : vector<2x1x4x64xbf16> to vector<2x4x64xbf16>
    %18 = vector.shape_cast %17 : vector<2x4x64xbf16> to vector<8x64xbf16>
    %c2 = arith.constant 2 : index
    %c0_10 = arith.constant 0 : index
    %c0_11 = arith.constant 0 : index
    %19 = vector.load %arg2[%c2, %c0_10, %c0_11] : memref<3x64x64xbf16, #tpu.memory_space<vmem>>, vector<1x64x64xbf16>
    %20 = vector.shape_cast %19 : vector<1x64x64xbf16> to vector<64x64xbf16>
    %cst_12 = arith.constant dense<0.000000e+00> : vector<8x64xf32>
    %21 = tpu.matmul %18, %20, %cst_12 {dimension_numbers = #tpu.dot_dimension_numbers<[1], [0], [0], [1], [0, 0, 1, 1], [], []>} : vector<8x64xbf16>, vector<64x64xbf16>, vector<8x64xf32> -> vector<8x64xf32>
    %22 = arith.addf %15, %21 : vector<8x64xf32>
    %c0_13 = arith.constant 0 : index
    %c0_14 = arith.constant 0 : index
    %23 = vector.load %arg3[%c0_13, %c0_14] : memref<1x64xf32, #tpu.memory_space<vmem>>, vector<1x64xf32>
    %24 = vector.broadcast %23 : vector<1x64xf32> to vector<8x64xf32>
    %25 = arith.addf %22, %24 : vector<8x64xf32>
    %cst_15 = arith.constant 0.000000e+00 : f32
    %26 = vector.broadcast %cst_15 : f32 to vector<8x64xf32>
    %27 = arith.maximumf %25, %26 : vector<8x64xf32>
    %28 = vector.shape_cast %27 : vector<8x64xf32> to vector<2x4x64xf32>
    %29 = arith.truncf %28 : vector<2x4x64xf32> to vector<2x4x64xbf16>
    %c0_16 = arith.constant 0 : index
    %c0_17 = arith.constant 0 : index
    %c0_18 = arith.constant 0 : index
    %30 = vector.load %arg4[%c0_16, %c0_17, %c0_18] : memref<2x4x64xbf16, #tpu.memory_space<vmem>>, vector<2x4x64xbf16>
    tpu.vector_store %arg4[%c0_16, %c0_17, %c0_18], %29 {strides = array<i32>} : memref<2x4x64xbf16, #tpu.memory_space<vmem>>, vector<2x4x64xbf16>,
    return
  }
  func.func @transform_0(%arg0: i32) -> (i32, i32, i32, i32) {
    %c0_i32 = arith.constant 0 : i32
    %c0_i32_0 = arith.constant 0 : i32
    %c0_i32_1 = arith.constant 0 : i32
    %c0_i32_2 = arith.constant 0 : i32
    return %arg0, %c0_i32, %c0_i32_0, %c0_i32_1 : i32, i32, i32, i32
  }
  func.func @transform_1(%arg0: i32) -> (i32, i32, i32) {
    %c0_i32 = arith.constant 0 : i32
    %c0_i32_0 = arith.constant 0 : i32
    %c0_i32_1 = arith.constant 0 : i32
    %c0_i32_2 = arith.constant 0 : i32
    return %c0_i32, %c0_i32_0, %c0_i32_1 : i32, i32, i32
  }
  func.func @transform_2(%arg0: i32) -> (i32, i32) {
    %c0_i32 = arith.constant 0 : i32
    %c0_i32_0 = arith.constant 0 : i32
    %c0_i32_1 = arith.constant 0 : i32
    return %c0_i32, %c0_i32_0 : i32, i32
  }
  func.func @transform_3(%arg0: i32) -> (i32, i32, i32) {
    %c0_i32 = arith.constant 0 : i32
    %c0_i32_0 = arith.constant 0 : i32
    %c0_i32_1 = arith.constant 0 : i32
    return %arg0, %c0_i32, %c0_i32_0 : i32, i32, i32
  }
}

module attributes {stable_mosaic.version = 11 : i64} {
  func.func @_linear_kernel(%arg0: i32, %arg1: i32, %arg2: i32, %arg3: memref<8x256xbf16, #tpu.memory_space<vmem>>, %arg4: memref<256x128xbf16, #tpu.memory_space<vmem>>, %arg5: memref<1x128xf32, #tpu.memory_space<vmem>>, %arg6: memref<8x128xbf16, #tpu.memory_space<vmem>>, %arg7: memref<8x128xf32, #tpu.memory_space<vmem>>) attributes {dimension_semantics = [#tpu.dimension_semantics<parallel>, #tpu.dimension_semantics<parallel>, #tpu.dimension_semantics<arbitrary>], iteration_bounds = array<i64: 1, 1, 1>, scalar_prefetch = 0 : i64, scratch_operands = 1 : i64, tpu.core_type = #tpu.core_type<tc>, window_params = [{transform_indices = @transform_0, window_bounds = array<i64: 8, 256>}, {transform_indices = @transform_1, window_bounds = array<i64: 256, 128>}, {transform_indices = @transform_2, window_bounds = array<i64: 1, 128>}, {transform_indices = @transform_3, window_bounds = array<i64: 8, 128>}]} {
    %c0_i32 = arith.constant 0 : i32
    %0 = arith.cmpi eq, %arg2, %c0_i32 : i32
    %1 = arith.extui %0 : i1 to i32
    %c0_i32_0 = arith.constant 0 : i32
    %2 = arith.cmpi ne, %1, %c0_i32_0 : i32
    scf.if %2 {
      %cst_10 = arith.constant 0.000000e+00 : f32
      %12 = vector.broadcast %cst_10 : f32 to vector<8x128xf32>
      %c0_11 = arith.constant 0 : index
      %c0_12 = arith.constant 0 : index
      %13 = vector.load %arg7[%c0_11, %c0_12] : memref<8x128xf32, #tpu.memory_space<vmem>>, vector<8x128xf32>
      tpu.vector_store %arg7[%c0_11, %c0_12], %12 {strides = array<i32>} : memref<8x128xf32, #tpu.memory_space<vmem>>, vector<8x128xf32>,
    } else {
    }
    %c0 = arith.constant 0 : index
    %c0_1 = arith.constant 0 : index
    %3 = vector.load %arg7[%c0, %c0_1] : memref<8x128xf32, #tpu.memory_space<vmem>>, vector<8x128xf32>
    %c0_2 = arith.constant 0 : index
    %c0_3 = arith.constant 0 : index
    %4 = vector.load %arg3[%c0_2, %c0_3] : memref<8x256xbf16, #tpu.memory_space<vmem>>, vector<8x256xbf16>
    %c0_4 = arith.constant 0 : index
    %c0_5 = arith.constant 0 : index
    %5 = vector.load %arg4[%c0_4, %c0_5] : memref<256x128xbf16, #tpu.memory_space<vmem>>, vector<256x128xbf16>
    %cst = arith.constant dense<0.000000e+00> : vector<8x128xf32>
    %6 = tpu.matmul %4, %5, %cst {dimension_numbers = #tpu.dot_dimension_numbers<[1], [0], [0], [1], [0, 0, 1, 1], [], []>} : vector<8x256xbf16>, vector<256x128xbf16>, vector<8x128xf32> -> vector<8x128xf32>
    %7 = arith.addf %3, %6 : vector<8x128xf32>
    %c0_6 = arith.constant 0 : index
    %c0_7 = arith.constant 0 : index
    %8 = vector.load %arg7[%c0_6, %c0_7] : memref<8x128xf32, #tpu.memory_space<vmem>>, vector<8x128xf32>
    tpu.vector_store %arg7[%c0_6, %c0_7], %7 {strides = array<i32>} : memref<8x128xf32, #tpu.memory_space<vmem>>, vector<8x128xf32>,
    %c0_i32_8 = arith.constant 0 : i32
    %9 = arith.cmpi eq, %arg2, %c0_i32_8 : i32
    %10 = arith.extui %9 : i1 to i32
    %c0_i32_9 = arith.constant 0 : i32
    %11 = arith.cmpi ne, %10, %c0_i32_9 : i32
    scf.if %11 {
      %c0_10 = arith.constant 0 : index
      %c0_11 = arith.constant 0 : index
      %12 = vector.load %arg7[%c0_10, %c0_11] : memref<8x128xf32, #tpu.memory_space<vmem>>, vector<8x128xf32>
      %c0_12 = arith.constant 0 : index
      %c0_13 = arith.constant 0 : index
      %13 = vector.load %arg5[%c0_12, %c0_13] : memref<1x128xf32, #tpu.memory_space<vmem>>, vector<1x128xf32>
      %14 = vector.broadcast %13 : vector<1x128xf32> to vector<8x128xf32>
      %15 = arith.addf %12, %14 : vector<8x128xf32>
      %16 = arith.truncf %15 : vector<8x128xf32> to vector<8x128xbf16>
      %c0_14 = arith.constant 0 : index
      %c0_15 = arith.constant 0 : index
      %17 = vector.load %arg6[%c0_14, %c0_15] : memref<8x128xbf16, #tpu.memory_space<vmem>>, vector<8x128xbf16>
      tpu.vector_store %arg6[%c0_14, %c0_15], %16 {strides = array<i32>} : memref<8x128xbf16, #tpu.memory_space<vmem>>, vector<8x128xbf16>,
    } else {
    }
    return
  }
  func.func @transform_0(%arg0: i32, %arg1: i32, %arg2: i32) -> (i32, i32) {
    %c0_i32 = arith.constant 0 : i32
    return %arg0, %arg2 : i32, i32
  }
  func.func @transform_1(%arg0: i32, %arg1: i32, %arg2: i32) -> (i32, i32) {
    %c0_i32 = arith.constant 0 : i32
    return %arg2, %arg1 : i32, i32
  }
  func.func @transform_2(%arg0: i32, %arg1: i32, %arg2: i32) -> (i32, i32) {
    %c0_i32 = arith.constant 0 : i32
    %c0_i32_0 = arith.constant 0 : i32
    return %c0_i32, %arg1 : i32, i32
  }
  func.func @transform_3(%arg0: i32, %arg1: i32, %arg2: i32) -> (i32, i32) {
    %c0_i32 = arith.constant 0 : i32
    return %arg0, %arg1 : i32, i32
  }
}

module attributes {stable_mosaic.version = 11 : i64} {
  func.func @_linear_kernel(%arg0: i32, %arg1: i32, %arg2: i32, %arg3: memref<8x128xbf16, #tpu.memory_space<vmem>>, %arg4: memref<128x256xbf16, #tpu.memory_space<vmem>>, %arg5: memref<1x256xf32, #tpu.memory_space<vmem>>, %arg6: memref<8x256xbf16, #tpu.memory_space<vmem>>, %arg7: memref<8x256xf32, #tpu.memory_space<vmem>>) attributes {dimension_semantics = [#tpu.dimension_semantics<parallel>, #tpu.dimension_semantics<parallel>, #tpu.dimension_semantics<arbitrary>], iteration_bounds = array<i64: 1, 1, 1>, scalar_prefetch = 0 : i64, scratch_operands = 1 : i64, tpu.core_type = #tpu.core_type<tc>, window_params = [{transform_indices = @transform_0, window_bounds = array<i64: 8, 128>}, {transform_indices = @transform_1, window_bounds = array<i64: 128, 256>}, {transform_indices = @transform_2, window_bounds = array<i64: 1, 256>}, {transform_indices = @transform_3, window_bounds = array<i64: 8, 256>}]} {
    %c0_i32 = arith.constant 0 : i32
    %0 = arith.cmpi eq, %arg2, %c0_i32 : i32
    %1 = arith.extui %0 : i1 to i32
    %c0_i32_0 = arith.constant 0 : i32
    %2 = arith.cmpi ne, %1, %c0_i32_0 : i32
    scf.if %2 {
      %cst_10 = arith.constant 0.000000e+00 : f32
      %12 = vector.broadcast %cst_10 : f32 to vector<8x256xf32>
      %c0_11 = arith.constant 0 : index
      %c0_12 = arith.constant 0 : index
      %13 = vector.load %arg7[%c0_11, %c0_12] : memref<8x256xf32, #tpu.memory_space<vmem>>, vector<8x256xf32>
      tpu.vector_store %arg7[%c0_11, %c0_12], %12 {strides = array<i32>} : memref<8x256xf32, #tpu.memory_space<vmem>>, vector<8x256xf32>,
    } else {
    }
    %c0 = arith.constant 0 : index
    %c0_1 = arith.constant 0 : index
    %3 = vector.load %arg7[%c0, %c0_1] : memref<8x256xf32, #tpu.memory_space<vmem>>, vector<8x256xf32>
    %c0_2 = arith.constant 0 : index
    %c0_3 = arith.constant 0 : index
    %4 = vector.load %arg3[%c0_2, %c0_3] : memref<8x128xbf16, #tpu.memory_space<vmem>>, vector<8x128xbf16>
    %c0_4 = arith.constant 0 : index
    %c0_5 = arith.constant 0 : index
    %5 = vector.load %arg4[%c0_4, %c0_5] : memref<128x256xbf16, #tpu.memory_space<vmem>>, vector<128x256xbf16>
    %cst = arith.constant dense<0.000000e+00> : vector<8x256xf32>
    %6 = tpu.matmul %4, %5, %cst {dimension_numbers = #tpu.dot_dimension_numbers<[1], [0], [0], [1], [0, 0, 1, 1], [], []>} : vector<8x128xbf16>, vector<128x256xbf16>, vector<8x256xf32> -> vector<8x256xf32>
    %7 = arith.addf %3, %6 : vector<8x256xf32>
    %c0_6 = arith.constant 0 : index
    %c0_7 = arith.constant 0 : index
    %8 = vector.load %arg7[%c0_6, %c0_7] : memref<8x256xf32, #tpu.memory_space<vmem>>, vector<8x256xf32>
    tpu.vector_store %arg7[%c0_6, %c0_7], %7 {strides = array<i32>} : memref<8x256xf32, #tpu.memory_space<vmem>>, vector<8x256xf32>,
    %c0_i32_8 = arith.constant 0 : i32
    %9 = arith.cmpi eq, %arg2, %c0_i32_8 : i32
    %10 = arith.extui %9 : i1 to i32
    %c0_i32_9 = arith.constant 0 : i32
    %11 = arith.cmpi ne, %10, %c0_i32_9 : i32
    scf.if %11 {
      %c0_10 = arith.constant 0 : index
      %c0_11 = arith.constant 0 : index
      %12 = vector.load %arg7[%c0_10, %c0_11] : memref<8x256xf32, #tpu.memory_space<vmem>>, vector<8x256xf32>
      %c0_12 = arith.constant 0 : index
      %c0_13 = arith.constant 0 : index
      %13 = vector.load %arg5[%c0_12, %c0_13] : memref<1x256xf32, #tpu.memory_space<vmem>>, vector<1x256xf32>
      %14 = vector.broadcast %13 : vector<1x256xf32> to vector<8x256xf32>
      %15 = arith.addf %12, %14 : vector<8x256xf32>
      %cst_14 = arith.constant 0.000000e+00 : f32
      %16 = vector.broadcast %cst_14 : f32 to vector<8x256xf32>
      %17 = arith.maximumf %15, %16 : vector<8x256xf32>
      %18 = arith.truncf %17 : vector<8x256xf32> to vector<8x256xbf16>
      %c0_15 = arith.constant 0 : index
      %c0_16 = arith.constant 0 : index
      %19 = vector.load %arg6[%c0_15, %c0_16] : memref<8x256xbf16, #tpu.memory_space<vmem>>, vector<8x256xbf16>
      tpu.vector_store %arg6[%c0_15, %c0_16], %18 {strides = array<i32>} : memref<8x256xbf16, #tpu.memory_space<vmem>>, vector<8x256xbf16>,
    } else {
    }
    return
  }
  func.func @transform_0(%arg0: i32, %arg1: i32, %arg2: i32) -> (i32, i32) {
    %c0_i32 = arith.constant 0 : i32
    return %arg0, %arg2 : i32, i32
  }
  func.func @transform_1(%arg0: i32, %arg1: i32, %arg2: i32) -> (i32, i32) {
    %c0_i32 = arith.constant 0 : i32
    return %arg2, %arg1 : i32, i32
  }
  func.func @transform_2(%arg0: i32, %arg1: i32, %arg2: i32) -> (i32, i32) {
    %c0_i32 = arith.constant 0 : i32
    %c0_i32_0 = arith.constant 0 : i32
    return %c0_i32, %arg1 : i32, i32
  }
  func.func @transform_3(%arg0: i32, %arg1: i32, %arg2: i32) -> (i32, i32) {
    %c0_i32 = arith.constant 0 : i32
    return %arg0, %arg1 : i32, i32
  }
}

module attributes {stable_mosaic.version = 11 : i64} {
  func.func @_conv3x3_kernel(%arg0: i32, %arg1: memref<2x1x10x64xbf16, #tpu.memory_space<vmem>>, %arg2: memref<3x64x64xbf16, #tpu.memory_space<vmem>>, %arg3: memref<1x64xf32, #tpu.memory_space<vmem>>, %arg4: memref<2x8x64xbf16, #tpu.memory_space<vmem>>) attributes {dimension_semantics = [#tpu.dimension_semantics<parallel>], iteration_bounds = array<i64: 1>, scalar_prefetch = 0 : i64, scratch_operands = 0 : i64, tpu.core_type = #tpu.core_type<tc>, window_params = [{transform_indices = @transform_0, window_bounds = array<i64: 2, 1, 10, 64>}, {pipeline_mode = #tpu.pipeline_mode<synchronous>, transform_indices = @transform_1, window_bounds = array<i64: 3, 64, 64>}, {pipeline_mode = #tpu.pipeline_mode<synchronous>, transform_indices = @transform_2, window_bounds = array<i64: 1, 64>}, {transform_indices = @transform_3, window_bounds = array<i64: 2, 8, 64>}]} {
    %c0 = arith.constant 0 : index
    %c0_0 = arith.constant 0 : index
    %c0_1 = arith.constant 0 : index
    %c0_2 = arith.constant 0 : index
    %0 = vector.load %arg1[%c0, %c0_0, %c0_1, %c0_2] : memref<2x1x10x64xbf16, #tpu.memory_space<vmem>>, vector<2x1x10x64xbf16>
    %cst = arith.constant 0.000000e+00 : f32
    %1 = vector.broadcast %cst : f32 to vector<16x64xf32>
    %2 = vector.extract_strided_slice %0 {offsets = [0, 0, 0, 0], sizes = [2, 1, 8, 64], strides = [1, 1, 1, 1]} : vector<2x1x10x64xbf16> to vector<2x1x8x64xbf16>
    %3 = vector.shape_cast %2 : vector<2x1x8x64xbf16> to vector<2x8x64xbf16>
    %4 = vector.shape_cast %3 : vector<2x8x64xbf16> to vector<16x64xbf16>
    %c0_3 = arith.constant 0 : index
    %c0_4 = arith.constant 0 : index
    %c0_5 = arith.constant 0 : index
    %5 = vector.load %arg2[%c0_3, %c0_4, %c0_5] : memref<3x64x64xbf16, #tpu.memory_space<vmem>>, vector<1x64x64xbf16>
    %6 = vector.shape_cast %5 : vector<1x64x64xbf16> to vector<64x64xbf16>
    %cst_6 = arith.constant dense<0.000000e+00> : vector<16x64xf32>
    %7 = tpu.matmul %4, %6, %cst_6 {dimension_numbers = #tpu.dot_dimension_numbers<[1], [0], [0], [1], [0, 0, 1, 1], [], []>} : vector<16x64xbf16>, vector<64x64xbf16>, vector<16x64xf32> -> vector<16x64xf32>
    %8 = arith.addf %1, %7 : vector<16x64xf32>
    %9 = vector.extract_strided_slice %0 {offsets = [0, 0, 1, 0], sizes = [2, 1, 8, 64], strides = [1, 1, 1, 1]} : vector<2x1x10x64xbf16> to vector<2x1x8x64xbf16>
    %10 = vector.shape_cast %9 : vector<2x1x8x64xbf16> to vector<2x8x64xbf16>
    %11 = vector.shape_cast %10 : vector<2x8x64xbf16> to vector<16x64xbf16>
    %c1 = arith.constant 1 : index
    %c0_7 = arith.constant 0 : index
    %c0_8 = arith.constant 0 : index
    %12 = vector.load %arg2[%c1, %c0_7, %c0_8] : memref<3x64x64xbf16, #tpu.memory_space<vmem>>, vector<1x64x64xbf16>
    %13 = vector.shape_cast %12 : vector<1x64x64xbf16> to vector<64x64xbf16>
    %cst_9 = arith.constant dense<0.000000e+00> : vector<16x64xf32>
    %14 = tpu.matmul %11, %13, %cst_9 {dimension_numbers = #tpu.dot_dimension_numbers<[1], [0], [0], [1], [0, 0, 1, 1], [], []>} : vector<16x64xbf16>, vector<64x64xbf16>, vector<16x64xf32> -> vector<16x64xf32>
    %15 = arith.addf %8, %14 : vector<16x64xf32>
    %16 = vector.extract_strided_slice %0 {offsets = [0, 0, 2, 0], sizes = [2, 1, 8, 64], strides = [1, 1, 1, 1]} : vector<2x1x10x64xbf16> to vector<2x1x8x64xbf16>
    %17 = vector.shape_cast %16 : vector<2x1x8x64xbf16> to vector<2x8x64xbf16>
    %18 = vector.shape_cast %17 : vector<2x8x64xbf16> to vector<16x64xbf16>
    %c2 = arith.constant 2 : index
    %c0_10 = arith.constant 0 : index
    %c0_11 = arith.constant 0 : index
    %19 = vector.load %arg2[%c2, %c0_10, %c0_11] : memref<3x64x64xbf16, #tpu.memory_space<vmem>>, vector<1x64x64xbf16>
    %20 = vector.shape_cast %19 : vector<1x64x64xbf16> to vector<64x64xbf16>
    %cst_12 = arith.constant dense<0.000000e+00> : vector<16x64xf32>
    %21 = tpu.matmul %18, %20, %cst_12 {dimension_numbers = #tpu.dot_dimension_numbers<[1], [0], [0], [1], [0, 0, 1, 1], [], []>} : vector<16x64xbf16>, vector<64x64xbf16>, vector<16x64xf32> -> vector<16x64xf32>
    %22 = arith.addf %15, %21 : vector<16x64xf32>
    %c0_13 = arith.constant 0 : index
    %c0_14 = arith.constant 0 : index
    %23 = vector.load %arg3[%c0_13, %c0_14] : memref<1x64xf32, #tpu.memory_space<vmem>>, vector<1x64xf32>
    %24 = vector.broadcast %23 : vector<1x64xf32> to vector<16x64xf32>
    %25 = arith.addf %22, %24 : vector<16x64xf32>
    %cst_15 = arith.constant 0.000000e+00 : f32
    %26 = vector.broadcast %cst_15 : f32 to vector<16x64xf32>
    %27 = arith.maximumf %25, %26 : vector<16x64xf32>
    %28 = vector.shape_cast %27 : vector<16x64xf32> to vector<2x8x64xf32>
    %29 = arith.truncf %28 : vector<2x8x64xf32> to vector<2x8x64xbf16>
    %c0_16 = arith.constant 0 : index
    %c0_17 = arith.constant 0 : index
    %c0_18 = arith.constant 0 : index
    %30 = vector.load %arg4[%c0_16, %c0_17, %c0_18] : memref<2x8x64xbf16, #tpu.memory_space<vmem>>, vector<2x8x64xbf16>
    tpu.vector_store %arg4[%c0_16, %c0_17, %c0_18], %29 {strides = array<i32>} : memref<2x8x64xbf16, #tpu.memory_space<vmem>>, vector<2x8x64xbf16>,
    return
  }
  func.func @transform_0(%arg0: i32) -> (i32, i32, i32, i32) {
    %c0_i32 = arith.constant 0 : i32
    %c0_i32_0 = arith.constant 0 : i32
    %c0_i32_1 = arith.constant 0 : i32
    %c0_i32_2 = arith.constant 0 : i32
    return %arg0, %c0_i32, %c0_i32_0, %c0_i32_1 : i32, i32, i32, i32
  }
  func.func @transform_1(%arg0: i32) -> (i32, i32, i32) {
    %c0_i32 = arith.constant 0 : i32
    %c0_i32_0 = arith.constant 0 : i32
    %c0_i32_1 = arith.constant 0 : i32
    %c0_i32_2 = arith.constant 0 : i32
    return %c0_i32, %c0_i32_0, %c0_i32_1 : i32, i32, i32
  }
  func.func @transform_2(%arg0: i32) -> (i32, i32) {
    %c0_i32 = arith.constant 0 : i32
    %c0_i32_0 = arith.constant 0 : i32
    %c0_i32_1 = arith.constant 0 : i32
    return %c0_i32, %c0_i32_0 : i32, i32
  }
  func.func @transform_3(%arg0: i32) -> (i32, i32, i32) {
    %c0_i32 = arith.constant 0 : i32
    %c0_i32_0 = arith.constant 0 : i32
    %c0_i32_1 = arith.constant 0 : i32
    return %arg0, %c0_i32, %c0_i32_0 : i32, i32, i32
  }
}

module attributes {stable_mosaic.version = 11 : i64} {
  func.func @_conv3x3_kernel(%arg0: i32, %arg1: memref<2x1x18x64xbf16, #tpu.memory_space<vmem>>, %arg2: memref<3x64x64xbf16, #tpu.memory_space<vmem>>, %arg3: memref<1x64xf32, #tpu.memory_space<vmem>>, %arg4: memref<2x16x64xf32, #tpu.memory_space<vmem>>) attributes {dimension_semantics = [#tpu.dimension_semantics<parallel>], iteration_bounds = array<i64: 1>, scalar_prefetch = 0 : i64, scratch_operands = 0 : i64, tpu.core_type = #tpu.core_type<tc>, window_params = [{transform_indices = @transform_0, window_bounds = array<i64: 2, 1, 18, 64>}, {pipeline_mode = #tpu.pipeline_mode<synchronous>, transform_indices = @transform_1, window_bounds = array<i64: 3, 64, 64>}, {pipeline_mode = #tpu.pipeline_mode<synchronous>, transform_indices = @transform_2, window_bounds = array<i64: 1, 64>}, {transform_indices = @transform_3, window_bounds = array<i64: 2, 16, 64>}]} {
    %c0 = arith.constant 0 : index
    %c0_0 = arith.constant 0 : index
    %c0_1 = arith.constant 0 : index
    %c0_2 = arith.constant 0 : index
    %0 = vector.load %arg1[%c0, %c0_0, %c0_1, %c0_2] : memref<2x1x18x64xbf16, #tpu.memory_space<vmem>>, vector<2x1x18x64xbf16>
    %cst = arith.constant 0.000000e+00 : f32
    %1 = vector.broadcast %cst : f32 to vector<32x64xf32>
    %2 = vector.extract_strided_slice %0 {offsets = [0, 0, 0, 0], sizes = [2, 1, 16, 64], strides = [1, 1, 1, 1]} : vector<2x1x18x64xbf16> to vector<2x1x16x64xbf16>
    %3 = vector.shape_cast %2 : vector<2x1x16x64xbf16> to vector<2x16x64xbf16>
    %4 = vector.shape_cast %3 : vector<2x16x64xbf16> to vector<32x64xbf16>
    %c0_3 = arith.constant 0 : index
    %c0_4 = arith.constant 0 : index
    %c0_5 = arith.constant 0 : index
    %5 = vector.load %arg2[%c0_3, %c0_4, %c0_5] : memref<3x64x64xbf16, #tpu.memory_space<vmem>>, vector<1x64x64xbf16>
    %6 = vector.shape_cast %5 : vector<1x64x64xbf16> to vector<64x64xbf16>
    %cst_6 = arith.constant dense<0.000000e+00> : vector<32x64xf32>
    %7 = tpu.matmul %4, %6, %cst_6 {dimension_numbers = #tpu.dot_dimension_numbers<[1], [0], [0], [1], [0, 0, 1, 1], [], []>} : vector<32x64xbf16>, vector<64x64xbf16>, vector<32x64xf32> -> vector<32x64xf32>
    %8 = arith.addf %1, %7 : vector<32x64xf32>
    %9 = vector.extract_strided_slice %0 {offsets = [0, 0, 1, 0], sizes = [2, 1, 16, 64], strides = [1, 1, 1, 1]} : vector<2x1x18x64xbf16> to vector<2x1x16x64xbf16>
    %10 = vector.shape_cast %9 : vector<2x1x16x64xbf16> to vector<2x16x64xbf16>
    %11 = vector.shape_cast %10 : vector<2x16x64xbf16> to vector<32x64xbf16>
    %c1 = arith.constant 1 : index
    %c0_7 = arith.constant 0 : index
    %c0_8 = arith.constant 0 : index
    %12 = vector.load %arg2[%c1, %c0_7, %c0_8] : memref<3x64x64xbf16, #tpu.memory_space<vmem>>, vector<1x64x64xbf16>
    %13 = vector.shape_cast %12 : vector<1x64x64xbf16> to vector<64x64xbf16>
    %cst_9 = arith.constant dense<0.000000e+00> : vector<32x64xf32>
    %14 = tpu.matmul %11, %13, %cst_9 {dimension_numbers = #tpu.dot_dimension_numbers<[1], [0], [0], [1], [0, 0, 1, 1], [], []>} : vector<32x64xbf16>, vector<64x64xbf16>, vector<32x64xf32> -> vector<32x64xf32>
    %15 = arith.addf %8, %14 : vector<32x64xf32>
    %16 = vector.extract_strided_slice %0 {offsets = [0, 0, 2, 0], sizes = [2, 1, 16, 64], strides = [1, 1, 1, 1]} : vector<2x1x18x64xbf16> to vector<2x1x16x64xbf16>
    %17 = vector.shape_cast %16 : vector<2x1x16x64xbf16> to vector<2x16x64xbf16>
    %18 = vector.shape_cast %17 : vector<2x16x64xbf16> to vector<32x64xbf16>
    %c2 = arith.constant 2 : index
    %c0_10 = arith.constant 0 : index
    %c0_11 = arith.constant 0 : index
    %19 = vector.load %arg2[%c2, %c0_10, %c0_11] : memref<3x64x64xbf16, #tpu.memory_space<vmem>>, vector<1x64x64xbf16>
    %20 = vector.shape_cast %19 : vector<1x64x64xbf16> to vector<64x64xbf16>
    %cst_12 = arith.constant dense<0.000000e+00> : vector<32x64xf32>
    %21 = tpu.matmul %18, %20, %cst_12 {dimension_numbers = #tpu.dot_dimension_numbers<[1], [0], [0], [1], [0, 0, 1, 1], [], []>} : vector<32x64xbf16>, vector<64x64xbf16>, vector<32x64xf32> -> vector<32x64xf32>
    %22 = arith.addf %15, %21 : vector<32x64xf32>
    %c0_13 = arith.constant 0 : index
    %c0_14 = arith.constant 0 : index
    %23 = vector.load %arg3[%c0_13, %c0_14] : memref<1x64xf32, #tpu.memory_space<vmem>>, vector<1x64xf32>
    %24 = vector.broadcast %23 : vector<1x64xf32> to vector<32x64xf32>
    %25 = arith.addf %22, %24 : vector<32x64xf32>
    %cst_15 = arith.constant 0.000000e+00 : f32
    %26 = vector.broadcast %cst_15 : f32 to vector<32x64xf32>
    %27 = arith.subf %26, %25 : vector<32x64xf32>
    %28 = math.exp %27 : vector<32x64xf32>
    %cst_16 = arith.constant 1.000000e+00 : f32
    %29 = vector.broadcast %cst_16 : f32 to vector<32x64xf32>
    %30 = arith.addf %29, %28 : vector<32x64xf32>
    %cst_17 = arith.constant 1.000000e+00 : f32
    %31 = vector.broadcast %cst_17 : f32 to vector<32x64xf32>
    %32 = arith.divf %31, %30 : vector<32x64xf32>
    %33 = vector.shape_cast %32 : vector<32x64xf32> to vector<2x16x64xf32>
    %c0_18 = arith.constant 0 : index
    %c0_19 = arith.constant 0 : index
    %c0_20 = arith.constant 0 : index
    %34 = vector.load %arg4[%c0_18, %c0_19, %c0_20] : memref<2x16x64xf32, #tpu.memory_space<vmem>>, vector<2x16x64xf32>
    tpu.vector_store %arg4[%c0_18, %c0_19, %c0_20], %33 {strides = array<i32>} : memref<2x16x64xf32, #tpu.memory_space<vmem>>, vector<2x16x64xf32>,
    return
  }
  func.func @transform_0(%arg0: i32) -> (i32, i32, i32, i32) {
    %c0_i32 = arith.constant 0 : i32
    %c0_i32_0 = arith.constant 0 : i32
    %c0_i32_1 = arith.constant 0 : i32
    %c0_i32_2 = arith.constant 0 : i32
    return %arg0, %c0_i32, %c0_i32_0, %c0_i32_1 : i32, i32, i32, i32
  }
  func.func @transform_1(%arg0: i32) -> (i32, i32, i32) {
    %c0_i32 = arith.constant 0 : i32
    %c0_i32_0 = arith.constant 0 : i32
    %c0_i32_1 = arith.constant 0 : i32
    %c0_i32_2 = arith.constant 0 : i32
    return %c0_i32, %c0_i32_0, %c0_i32_1 : i32, i32, i32
  }
  func.func @transform_2(%arg0: i32) -> (i32, i32) {
    %c0_i32 = arith.constant 0 : i32
    %c0_i32_0 = arith.constant 0 : i32
    %c0_i32_1 = arith.constant 0 : i32
    return %c0_i32, %c0_i32_0 : i32, i32
  }
  func.func @transform_3(%arg0: i32) -> (i32, i32, i32) {
    %c0_i32 = arith.constant 0 : i32
    %c0_i32_0 = arith.constant 0 : i32
    %c0_i32_1 = arith.constant 0 : i32
    return %arg0, %c0_i32, %c0_i32_0 : i32, i32, i32
  }
}

</mosaic_0001>

<bundles_post_ra>
// kernel: _lambda_.7
= control target key start
LH: loop header
LB: loop body
LE: loop exit
PB: predicated region body
PF: predicated region fallthrough
CT: control target
= control target key end

     0   :  { %v42_v0 = vlaneseq  ;;  %v448_v1 = vmov 0.0   ;;  %v449_v3 = vmov 1983009808   ;;  %vm450_vm0 = vmmov 0   ;;  %s546_s1 = inlined_call_operand.vmem [shape: bf16[3,64,64], index: 1, kind: input, shape index: {}]   ;;  %s547_s0 = inlined_call_operand.vmem [shape: bf16[2,2,5,64], index: 0, kind: input, shape index: {}]   ;;  %s548_s2 = inlined_call_operand.vmem [shape: f32[1,64], index: 2, kind: input, shape index: {}]   ;;  %s549_s3 = inlined_call_operand.vmem [shape: bf16[2,4,64], index: 3, kind: output, shape index: {}]  }
   0x1   :  { %395 = vmatprep.subr.bf16.mxu0 %v448_v1  ;;  %v434_v2 = vld [vmem:[%s546_s1 + $0x20] sm:$0xff]   ;;  %407 = vmatprep.subr.bf16.mxu1 %v448_v1  ;;  %v40_v4 = vunpack.c.l.s4 %v449_v3  ;;  %v436_v6 = vld [vmem:[%s546_s1 + $0x28] sm:$0xff]   ;;  %v438_v10 = vld [vmem:[%s546_s1 + $0x30] sm:$0xff]   ;;  %vm70_vm1 = vcmask 523264   ;;  %vm207_vm2 = vsmask.f32 1280 }
   0x2   :  { %v435_v5 = vld [vmem:[%s546_s1] sm:$0xff]   ;;  %403 = vmatprep.mubr.msk.bf16.mxu0 %vm450_vm0, %v448_v1  ;;  %415 = vmatprep.mubr.msk.bf16.mxu1 %vm450_vm0, %v448_v1  ;;  %v437_v7 = vld [vmem:[%s546_s1 + $0x8] sm:$0xff]   ;;  %v43_v9 = vshrl.u32 %v42_v0, 7  ;;  %v439_v11 = vld [vmem:[%s546_s1 + $0x10] sm:$0xff]   ;;  %vm208_vm3 = vsmask.f32 3336 }
   0x3   :  { %396 = vmatpush3.bf16.msra.mxu0 %v434_v2  ;;  %408 = vmatpush3.bf16.msra.mxu1 %v435_v5  ;;  %v41_v8 = vunpack.c.0.s8 %v40_v4  ;;  %v15_v13 = vld [vmem:[%s547_s0] sm:$0x7]  ;;  %v440_v14 = vld [vmem:[%s546_s1 + $0x38] sm:$0xff]   ;;  %v442_v15 = vld [vmem:[%s547_s0 + $0x4] ss:$8 sps:$4 sm:$0x77]  }
   0x4   :  { %397 = vmatprep.subr.bf16.mxu0 %v448_v1  ;;  %409 = vmatprep.subr.bf16.mxu1 %v448_v1  ;;  %v17_v16 = vld [vmem:[%s547_s0 + $0x8] sm:$0x7]  ;;  %v441_v20 = vld [vmem:[%s546_s1 + $0x18] sm:$0xff]   ;;  %v444_v31 = vld [vmem:[%s546_s1 + $0x40] sm:$0xff]   ;;  %vm210_vm5 = vsmask.f32 5392 }
   0x5   :  { %v44_v12 = vsub.s32 %v41_v8, %v43_v9  ;;  %v116_v18 = vcombine.low %v15_v13, %v17_v16  ;;  %vm209_vm4 = vmor %vm207_vm2, %vm208_vm3  ;;  %vm212_vm6 = vsmask.f32 7448  ;;  %v445_v42 = vld [vmem:[%s546_s1 + $0x48] sm:$0xff]   ;;  %v446_v43 = vld [vmem:[%s546_s1 + $0x50] sm:$0xff]   ;;  %vm341_vm9 = vcmask 517120  }
   0x6   :  { %vm211_vm7 = vmor %vm209_vm4, %vm210_vm5  ;;  %v447_v47 = vld [vmem:[%s546_s1 + $0x58] sm:$0xff]   ;;  %v379_v59 = vld [vmem:[%s548_s2] ss:$0 sm:$0xff] }
   0x7   :  { %398 = vmatpush3.bf16.msra.mxu0 %v436_v6  ;;  %410 = vmatpush3.bf16.msra.mxu1 %v437_v7  ;;  %v197_v17 = vrot.slane %v15_v13, %v44_v12  ;;  %v205_v19 = vrot.slane %v17_v16, %v44_v12  ;;  %v45_v27 = vrot.slane %v442_v15, %v44_v12  ;;  %vm213_vm8 = vmor %vm211_vm7, %vm212_vm6 }
   0x8   :  { %399 = vmatprep.subr.bf16.mxu0 %v448_v1  ;;  %411 = vmatprep.subr.bf16.mxu1 %v448_v1  ;;  %v123_v28 = vrot.slane %v116_v18, %v44_v12 }
   0x9   :  { %v198_v21 = vcombine.high %v197_v17, %v197_v17  ;;  %v215_v22 = vshrl.u32 %v197_v17, 16  ;;  %v218_v23 = vshll.u32 %v197_v17, 16  ;;  %v206_v24 = vcombine.high %v205_v19, %v205_v19 }
   0xa   :  { %v229_v25 = vshrl.u32 %v205_v19, 16  ;;  %v232_v26 = vshll.u32 %v205_v19, 16 }
   0xb   :  { %400 = vmatpush3.bf16.msra.mxu0 %v438_v10  ;;  %412 = vmatpush3.bf16.msra.mxu1 %v439_v11  ;;  %v217_v29 = vrot.slane %v215_v22, 6  ;;  %v220_v30 = vrot.slane %v218_v23, 7  ;;  %v224_v32 = vshll.u32 %v198_v21, 16  ;;  %v238_v35 = vshll.u32 %v206_v24, 16 }
   0xc   :  { %401 = vmatprep.subr.bf16.mxu0 %v448_v1  ;;  %413 = vmatprep.subr.bf16.mxu1 %v448_v1  ;;  %v231_v33 = vrot.slane %v229_v25, 6  ;;  %v234_v34 = vrot.slane %v232_v26, 7 }
   0xd   :  { %v221_v36 = vor.u32 %v220_v30, %v217_v29  ;;  %v226_v39 = vrot.slane %v224_v32, 7  ;;  %v240_v41 = vrot.slane %v238_v35, 7 }
   0xe   :  { %v235_v37 = vor.u32 %v234_v34, %v231_v33 }
   0xf   :  { %402 = vmatpush3.bf16.msra.mxu0 %v440_v14  ;;  %414 = vmatpush3.bf16.msra.mxu1 %v441_v20  ;;  %v222_v38 = vrot.slane %v221_v36, 2 }
  0x10   :  { %419 = vmatprep.subr.bf16.mxu0 %v448_v1  ;;  %v236_v40 = vrot.slane %v235_v37, 2 }
  0x11   :  { %v227_v44 = vsel %vm213_vm8, %v222_v38, %v226_v39 }
  0x12   :  { %404 = vmatmul.mubr.msk.bf16.vlgmr.msra.gmra.mrb[0].mxu0 %vm70_vm1, %v45_v27  ;;  %416 = vmatmul.mubr.msk.bf16.vlgmr.msra.gmra.mrb[0].mxu1 %vm70_vm1, %v123_v28  ;;  %v241_v45 = vsel %vm213_vm8, %v236_v40, %v240_v41 }
  0x13   :  { %420 = vmatpush3.bf16.msra.mxu0 %v444_v31  ;;  %427 = vmatprep.mubr.msk.bf16.mxu0 %vm450_vm0, %v448_v1  ;;  %v251_v46 = vcombine.low %v227_v44, %v241_v45 }
  0x14   :  { %421 = vmatprep.subr.bf16.mxu0 %v448_v1 }
  0x15   :  { %v258_v48 = vrot.slane %v251_v46, %v44_v12 }
  0x17   :  { %422 = vmatpush3.bf16.msra.mxu0 %v445_v42 }
  0x18   :  { %423 = vmatprep.subr.bf16.mxu0 %v448_v1 }
  0x1b   :  { %424 = vmatpush3.bf16.msra.mxu0 %v446_v43 }
  0x1c   :  { %425 = vmatprep.subr.bf16.mxu0 %v448_v1 }
  0x1f   :  { %426 = vmatpush3.bf16.msra.mxu0 %v447_v47 }
  0x22   :  { %428 = vmatmul.mubr.msk.bf16.vlgmr.msra.gmra.mrb[4].mxu0 %vm70_vm1, %v258_v48 }
  0xe5   :  { %v108_v49 = vpop.f32.mrb[0].mxu0  ;;  %v185_v51 = vpop.f32.mrb[0].mxu1 }
  0xe6   :  { %v405_v50 = vpop.f32.mrb[1].mxu0  ;;  %v186_v52 = vadd.f32 %v185_v51, %v108_v49  ;;  %v417_v54 = vpop.f32.mrb[1].mxu1 }
  0xe7   :  { %v111_v53 = vpop.f32.mrb[2].mxu0  ;;  %v188_v56 = vpop.f32.mrb[2].mxu1 }
  0xe8   :  { %v406_v55 = vpop.f32.mrb[3].mxu0  ;;  %v418_v57 = vpop.f32.mrb[3].mxu1 }
  0xf5   :  { %v320_v58 = vpop.f32.mrb[4].mxu0 }
  0xf6   :  { %v326_v60 = vadd.f32 %v320_v58, %v186_v52  ;;  %v429_v61 = vpop.f32.mrb[5].mxu0 }
  0xf7   :  { %v323_v62 = vpop.f32.mrb[6].mxu0 }
  0xf8   :  { %v334_v63 = vadd.f32 %v379_v59, %v326_v60  ;;  %v430_v0 = vpop.f32.mrb[7].mxu0 }
  0xfa   :  { %v335_v1 = vmax.f32 %v334_v63, 0.0 }
  0xfc   :  { %v337_v2 = vcombine.high %v335_v1, %v335_v1  ;;  %v339_v3 = vpack.c.bf16 %v335_v1, %v335_v1 }
  0xfe   :  { %v340_v4 = vpack.c.bf16 %v337_v2, %v337_v2  ;;  %342 = vst.msk [vmem:[%s549_s3] sm:$0x3] %vm341_vm9, %v339_v3 }
 0x100   :  { %343 = vst.msk [vmem:[%s549_s3 + $0x2] sm:$0x3] %vm341_vm9, %v340_v4 }

// kernel: _lambda_.8
= control target key start
LH: loop header
LB: loop body
LE: loop exit
PB: predicated region body
PF: predicated region fallthrough
CT: control target
= control target key end

     0   :  { %s353_s1 = inlined_call_operand.vmem [shape: bf16[256,128], index: 1, kind: input, shape index: {}]   ;;  %s354_s0 = inlined_call_operand.vmem [shape: bf16[8,256], index: 0, kind: input, shape index: {}]   ;;  %s355_s2 = inlined_call_operand.vmem [shape: f32[1,128], index: 2, kind: input, shape index: {}]   ;;  %s356_s3 = inlined_call_operand.vmem [shape: bf16[8,128], index: 3, kind: output, shape index: {}]  }
   0x1   :  { %v258_v0 = vld [vmem:[%s353_s1 + $0x40] sm:$0xff]   ;;  %v260_v2 = vld [vmem:[%s353_s1 + $0x48] sm:$0xff]   ;;  %v262_v4 = vld [vmem:[%s353_s1 + $0x50] sm:$0xff]  }
   0x2   :  { %v259_v1 = vld [vmem:[%s353_s1] sm:$0xff]   ;;  %236 = vmatprep.subr.bf16.mxu0 %v258_v0  ;;  %v261_v3 = vld [vmem:[%s353_s1 + $0x8] sm:$0xff]   ;;  %v263_v5 = vld [vmem:[%s353_s1 + $0x10] sm:$0xff]  }
   0x3   :  { %237 = vmatpush3.bf16.msra.mxu0 %v259_v1  ;;  %v264_v6 = vld [vmem:[%s353_s1 + $0x58] sm:$0xff]   ;;  %v266_v8 = vld [vmem:[%s353_s1 + $0x60] sm:$0xff]   ;;  %v268_v10 = vld [vmem:[%s353_s1 + $0x68] sm:$0xff]  }
   0x4   :  { %238 = vmatprep.subr.bf16.mxu0 %v260_v2  ;;  %v265_v7 = vld [vmem:[%s353_s1 + $0x18] sm:$0xff]   ;;  %v267_v9 = vld [vmem:[%s353_s1 + $0x20] sm:$0xff]   ;;  %v269_v13 = vld [vmem:[%s353_s1 + $0x28] sm:$0xff]  }
   0x5   :  { %v21_v11 = vld [vmem:[%s354_s0] sm:$0xff]  ;;  %v270_v14 = vld [vmem:[%s353_s1 + $0x70] sm:$0xff]   ;;  %v272_v16 = vld [vmem:[%s353_s1 + $0x78] sm:$0xff]  }
   0x6   :  { %v218_v12 = vcombine.high %v21_v11, %v21_v11  ;;  %v271_v15 = vld [vmem:[%s353_s1 + $0x30] sm:$0xff]   ;;  %v273_v17 = vld [vmem:[%s353_s1 + $0x38] sm:$0xff]   ;;  %v217_v18 = vcombine.low %v21_v11, %v21_v11  ;;  %v235_v21 = vld [vmem:[%s355_s2] ss:$0 sm:$0xff] }
   0x7   :  { %239 = vmatpush3.bf16.msra.mxu0 %v261_v3 }
   0x8   :  { %240 = vmatprep.subr.bf16.mxu0 %v262_v4  ;;  %189 = vmatprep.mubr.bf16.mxu0 %v218_v12 }
   0xb   :  { %241 = vmatpush3.bf16.msra.mxu0 %v263_v5 }
   0xc   :  { %242 = vmatprep.subr.bf16.mxu0 %v264_v6 }
   0xf   :  { %243 = vmatpush3.bf16.msra.mxu0 %v265_v7 }
  0x10   :  { %244 = vmatprep.subr.bf16.mxu0 %v266_v8 }
  0x13   :  { %245 = vmatpush3.bf16.msra.mxu0 %v267_v9 }
  0x14   :  { %246 = vmatprep.subr.bf16.mxu0 %v268_v10 }
  0x17   :  { %247 = vmatpush3.bf16.msra.mxu0 %v269_v13 }
  0x18   :  { %248 = vmatprep.subr.bf16.mxu0 %v270_v14 }
  0x1b   :  { %249 = vmatpush3.bf16.msra.mxu0 %v271_v15 }
  0x1c   :  { %250 = vmatprep.subr.bf16.mxu0 %v272_v16 }
  0x1f   :  { %251 = vmatpush3.bf16.msra.mxu0 %v273_v17 }
  0x22   :  { %190 = vmatmul.mubr.bf16.vlgmr.msra.gmra.mrb[0].mxu0 %v217_v18 }
  0xf5   :  { %v252_v19 = vpop.f32.mrb[0].mxu0 }
  0xf6   :  { %v253_v20 = vpop.f32.mrb[1].mxu0 }
  0xf7   :  { %v254_v22 = vadd.f32 %v253_v20, %v252_v19  ;;  %v255_v23 = vpop.f32.mrb[2].mxu0 }
  0xf8   :  { %v256_v24 = vpop.f32.mrb[3].mxu0 }
  0xf9   :  { %v210_v25 = vadd.f32 %v254_v22, %v235_v21 }
  0xfb   :  { %v211_v26 = vpack.c.bf16 %v210_v25, %v210_v25 }
  0xfd   :  { %212 = vst [vmem:[%s356_s3] sm:$0xf] %v211_v26 }

// kernel: _lambda_.9
= control target key start
LH: loop header
LB: loop body
LE: loop exit
PB: predicated region body
PF: predicated region fallthrough
CT: control target
= control target key end

     0   :  { %v242_v1 = vmov 0   ;;  %v172_v18 = vlaneseq  ;;  %s320_s1 = inlined_call_operand.vmem [shape: bf16[128,256], index: 1, kind: input, shape index: {}]   ;;  %s321_s0 = inlined_call_operand.vmem [shape: bf16[8,128], index: 0, kind: input, shape index: {}]   ;;  %s322_s2 = inlined_call_operand.vmem [shape: f32[1,256], index: 2, kind: input, shape index: {}]   ;;  %s323_s3 = inlined_call_operand.vmem [shape: bf16[8,256], index: 3, kind: output, shape index: {}]  }
   0x1   :  { %v218_v0 = vld [vmem:[%s320_s1 + $0x4] ss:$8 sps:$4 sm:$0xff]   ;;  %152 = vmatprep.mubr.bf16.mxu0 %v242_v1  ;;  %v220_v2 = vld [vmem:[%s320_s1] ss:$8 sps:$4 sm:$0xff]   ;;  %v221_v3 = vld [vmem:[%s320_s1 + $0x14] ss:$8 sps:$4 sm:$0xff]  }
   0x2   :  { %120 = vmatprep.subr.bf16.mxu0 %v218_v0  ;;  %v223_v4 = vld [vmem:[%s320_s1 + $0x10] ss:$8 sps:$4 sm:$0xff]   ;;  %v224_v5 = vld [vmem:[%s320_s1 + $0x24] ss:$8 sps:$4 sm:$0xff]   ;;  %v226_v6 = vld [vmem:[%s320_s1 + $0x20] ss:$8 sps:$4 sm:$0xff]  }
   0x3   :  { %121 = vmatpush1.bf16.msra.mxu0 %v220_v2  ;;  %v227_v7 = vld [vmem:[%s320_s1 + $0x34] ss:$8 sps:$4 sm:$0xff]   ;;  %v229_v8 = vld [vmem:[%s320_s1 + $0x30] ss:$8 sps:$4 sm:$0xff]   ;;  %v230_v9 = vld [vmem:[%s320_s1 + $0x44] ss:$8 sps:$4 sm:$0xff]  }
   0x4   :  { %122 = vmatprep.subr.bf16.mxu0 %v221_v3  ;;  %v232_v10 = vld [vmem:[%s320_s1 + $0x40] ss:$8 sps:$4 sm:$0xff]   ;;  %v233_v11 = vld [vmem:[%s320_s1 + $0x54] ss:$8 sps:$4 sm:$0xff]   ;;  %v235_v12 = vld [vmem:[%s320_s1 + $0x50] ss:$8 sps:$4 sm:$0xff]  }
   0x5   :  { %v236_v13 = vld [vmem:[%s320_s1 + $0x64] ss:$8 sps:$4 sm:$0xff]   ;;  %v238_v14 = vld [vmem:[%s320_s1 + $0x60] ss:$8 sps:$4 sm:$0xff]   ;;  %v239_v15 = vld [vmem:[%s320_s1 + $0x74] ss:$8 sps:$4 sm:$0xff]  }
   0x6   :  { %v241_v16 = vld [vmem:[%s320_s1 + $0x70] ss:$8 sps:$4 sm:$0xff]   ;;  %v23_v17 = vld [vmem:[%s321_s0] sm:$0xf]  ;;  %v173_v19 = vshrl.u32 %v172_v18, 7 }
   0x7   :  { %123 = vmatpush1.bf16.msra.mxu0 %v223_v4  ;;  %v170_v21 = vld [vmem:[%s322_s2] sm:$0x3] }
   0x8   :  { %124 = vmatprep.subr.bf16.mxu0 %v224_v5  ;;  %v174_v20 = vsub.s32 0, %v173_v19  ;;  %v178_v22 = vsub.s32 1, %v173_v19 }
   0xa   :  { %v175_v23 = vrot.slane %v170_v21, %v174_v20  ;;  %v179_v24 = vrot.slane %v170_v21, %v178_v22 }
   0xb   :  { %125 = vmatpush1.bf16.msra.mxu0 %v226_v6 }
   0xc   :  { %126 = vmatprep.subr.bf16.mxu0 %v227_v7 }
   0xf   :  { %127 = vmatpush1.bf16.msra.mxu0 %v229_v8 }
  0x10   :  { %128 = vmatprep.subr.bf16.mxu0 %v230_v9 }
  0x13   :  { %129 = vmatpush1.bf16.msra.mxu0 %v232_v10 }
  0x14   :  { %130 = vmatprep.subr.bf16.mxu0 %v233_v11 }
  0x17   :  { %131 = vmatpush1.bf16.msra.mxu0 %v235_v12 }
  0x18   :  { %132 = vmatprep.subr.bf16.mxu0 %v236_v13 }
  0x1b   :  { %133 = vmatpush1.bf16.msra.mxu0 %v238_v14 }
  0x1c   :  { %134 = vmatprep.subr.bf16.mxu0 %v239_v15 }
  0x1f   :  { %135 = vmatpush1.bf16.msra.mxu0 %v241_v16 }
  0x22   :  { %153 = vmatmul.mubr.bf16.vlgmr.msra.gmra.mrb[0].mxu0 %v23_v17 }
  0xf5   :  { %v154_v25 = vpop.f32.mrb[0].mxu0 }
  0xf6   :  { %v182_v26 = vadd.f32 %v175_v23, %v154_v25  ;;  %v156_v27 = vpop.f32.mrb[1].mxu0 }
  0xf7   :  { %v183_v28 = vadd.f32 %v179_v24, %v156_v27  ;;  %v158_v29 = vpop.f32.mrb[2].mxu0 }
  0xf8   :  { %v184_v30 = vmax.f32 %v182_v26, 0.0  ;;  %v159_v31 = vpop.f32.mrb[3].mxu0 }
  0xf9   :  { %v185_v32 = vmax.f32 %v183_v28, 0.0 }
  0xfb   :  { %v216_v33 = vpack.c.bf16 %v185_v32, %v184_v30 }
  0xfd   :  { %194 = vst [vmem:[%s323_s3] sm:$0xff] %v216_v33 }

// kernel: _lambda_.6
= control target key start
LH: loop header
LB: loop body
LE: loop exit
PB: predicated region body
PF: predicated region fallthrough
CT: control target
= control target key end

     0   :  { %v420_v0 = vmov 0.0   ;;  %vm421_vm0 = vmmov 0   ;;  %vm67_vm1 = vcmask 523264   ;;  %vm185_vm2 = vsmask.f32 3328  ;;  %s523_s1 = inlined_call_operand.vmem [shape: bf16[3,64,64], index: 1, kind: input, shape index: {}]   ;;  %s524_s0 = inlined_call_operand.vmem [shape: bf16[2,2,9,64], index: 0, kind: input, shape index: {}]   ;;  %s525_s2 = inlined_call_operand.vmem [shape: f32[1,64], index: 2, kind: input, shape index: {}]   ;;  %s526_s3 = inlined_call_operand.vmem [shape: bf16[2,8,64], index: 3, kind: output, shape index: {}]  }
   0x1   :  { %368 = vmatprep.subr.bf16.mxu0 %v420_v0  ;;  %380 = vmatprep.subr.bf16.mxu1 %v420_v0  ;;  %v406_v1 = vld [vmem:[%s523_s1 + $0x20] sm:$0xff]   ;;  %v408_v3 = vld [vmem:[%s523_s1 + $0x28] sm:$0xff]   ;;  %v410_v5 = vld [vmem:[%s523_s1 + $0x30] sm:$0xff]   ;;  %vm186_vm3 = vsmask.f32 7440  ;;  %vm311_vm5 = vcmask 519168  }
   0x2   :  { %v407_v2 = vld [vmem:[%s523_s1] sm:$0xff]   ;;  %376 = vmatprep.mubr.msk.bf16.mxu0 %vm421_vm0, %v420_v0  ;;  %388 = vmatprep.mubr.msk.bf16.mxu1 %vm421_vm0, %v420_v0  ;;  %v409_v4 = vld [vmem:[%s523_s1 + $0x8] sm:$0xff]   ;;  %v411_v6 = vld [vmem:[%s523_s1 + $0x10] sm:$0xff]  }
   0x3   :  { %369 = vmatpush3.bf16.msra.mxu0 %v406_v1  ;;  %381 = vmatpush3.bf16.msra.mxu1 %v407_v2  ;;  %v15_v7 = vld [vmem:[%s524_s0] sm:$0xf]  ;;  %v18_v8 = vld [vmem:[%s524_s0 + $0x10] sm:$0xf]  ;;  %v412_v9 = vld [vmem:[%s523_s1 + $0x38] sm:$0xff]  }
   0x4   :  { %370 = vmatprep.subr.bf16.mxu0 %v420_v0  ;;  %382 = vmatprep.subr.bf16.mxu1 %v420_v0  ;;  %v189_v10 = vshrl.u32 %v15_v7, 16  ;;  %v192_v11 = vshll.u32 %v15_v7, 16  ;;  %v203_v12 = vshrl.u32 %v18_v8, 16  ;;  %v413_v13 = vld [vmem:[%s523_s1 + $0x18] sm:$0xff]   ;;  %v206_v14 = vshll.u32 %v18_v8, 16  ;;  %v416_v17 = vld [vmem:[%s523_s1 + $0x40] sm:$0xff]   ;;  %vm187_vm4 = vmor %vm185_vm2, %vm186_vm3 }
   0x5   :  { %v414_v15 = vld [vmem:[%s524_s0 + $0x8] ss:$16 sps:$4 sm:$0xff]   ;;  %v332_v16 = vcombine.low %v15_v7, %v18_v8  ;;  %v16_v22 = vld [vmem:[%s524_s0 + $0x4] sm:$0x1]  ;;  %v19_v23 = vld [vmem:[%s524_s0 + $0x14] sm:$0x1] }
   0x6   :  { %v191_v18 = vrot.slane %v189_v10, 4  ;;  %v194_v19 = vrot.slane %v192_v11, 5  ;;  %v205_v20 = vrot.slane %v203_v12, 4  ;;  %v208_v21 = vrot.slane %v206_v14, 5  ;;  %v417_v26 = vld [vmem:[%s523_s1 + $0x48] sm:$0xff]   ;;  %v418_v31 = vld [vmem:[%s523_s1 + $0x50] sm:$0xff]  }
   0x7   :  { %371 = vmatpush3.bf16.msra.mxu0 %v408_v3  ;;  %383 = vmatpush3.bf16.msra.mxu1 %v409_v4  ;;  %v198_v27 = vshll.u32 %v16_v22, 16  ;;  %v212_v28 = vshll.u32 %v19_v23, 16  ;;  %v419_v34 = vld [vmem:[%s523_s1 + $0x58] sm:$0xff]   ;;  %v352_v49 = vld [vmem:[%s525_s2] ss:$0 sm:$0xff] }
   0x8   :  { %372 = vmatprep.subr.bf16.mxu0 %v420_v0  ;;  %384 = vmatprep.subr.bf16.mxu1 %v420_v0  ;;  %v195_v24 = vor.u32 %v194_v19, %v191_v18  ;;  %v209_v25 = vor.u32 %v208_v21, %v205_v20 }
   0x9   :  { %v200_v32 = vrot.slane %v198_v27, 5  ;;  %v214_v33 = vrot.slane %v212_v28, 5 }
   0xa   :  { %v196_v29 = vrot.slane %v195_v24, 4  ;;  %v210_v30 = vrot.slane %v209_v25, 4 }
   0xb   :  { %373 = vmatpush3.bf16.msra.mxu0 %v410_v5  ;;  %385 = vmatpush3.bf16.msra.mxu1 %v411_v6 }
   0xc   :  { %374 = vmatprep.subr.bf16.mxu0 %v420_v0  ;;  %386 = vmatprep.subr.bf16.mxu1 %v420_v0  ;;  %v201_v35 = vsel %vm187_vm4, %v196_v29, %v200_v32  ;;  %v215_v36 = vsel %vm187_vm4, %v210_v30, %v214_v33 }
   0xd   :  { %v346_v37 = vcombine.low %v201_v35, %v215_v36 }
   0xf   :  { %375 = vmatpush3.bf16.msra.mxu0 %v412_v9  ;;  %387 = vmatpush3.bf16.msra.mxu1 %v413_v13 }
  0x10   :  { %392 = vmatprep.subr.bf16.mxu0 %v420_v0 }
  0x12   :  { %377 = vmatmul.mubr.msk.bf16.vlgmr.msra.gmra.mrb[0].mxu0 %vm67_vm1, %v414_v15  ;;  %389 = vmatmul.mubr.msk.bf16.vlgmr.msra.gmra.mrb[0].mxu1 %vm67_vm1, %v332_v16 }
  0x13   :  { %393 = vmatpush3.bf16.msra.mxu0 %v416_v17  ;;  %400 = vmatprep.mubr.msk.bf16.mxu0 %vm421_vm0, %v420_v0 }
  0x14   :  { %394 = vmatprep.subr.bf16.mxu0 %v420_v0 }
  0x17   :  { %395 = vmatpush3.bf16.msra.mxu0 %v417_v26 }
  0x18   :  { %396 = vmatprep.subr.bf16.mxu0 %v420_v0 }
  0x1b   :  { %397 = vmatpush3.bf16.msra.mxu0 %v418_v31 }
  0x1c   :  { %398 = vmatprep.subr.bf16.mxu0 %v420_v0 }
  0x1f   :  { %399 = vmatpush3.bf16.msra.mxu0 %v419_v34 }
  0x22   :  { %401 = vmatmul.mubr.msk.bf16.vlgmr.msra.gmra.mrb[4].mxu0 %vm67_vm1, %v346_v37 }
  0xe5   :  { %v105_v38 = vpop.f32.mrb[0].mxu0  ;;  %v178_v39 = vpop.f32.mrb[0].mxu1 }
  0xe6   :  { %v378_v40 = vpop.f32.mrb[1].mxu0  ;;  %v179_v41 = vadd.f32 %v178_v39, %v105_v38  ;;  %v390_v42 = vpop.f32.mrb[1].mxu1 }
  0xe7   :  { %v108_v43 = vpop.f32.mrb[2].mxu0  ;;  %v181_v44 = vpop.f32.mrb[2].mxu1 }
  0xe8   :  { %v379_v45 = vpop.f32.mrb[3].mxu0  ;;  %v182_v46 = vadd.f32 %v181_v44, %v108_v43  ;;  %v391_v47 = vpop.f32.mrb[3].mxu1 }
  0xf5   :  { %v289_v48 = vpop.f32.mrb[4].mxu0 }
  0xf6   :  { %v296_v50 = vadd.f32 %v289_v48, %v179_v41  ;;  %v402_v51 = vpop.f32.mrb[5].mxu0 }
  0xf7   :  { %v292_v52 = vpop.f32.mrb[6].mxu0 }
  0xf8   :  { %v305_v53 = vadd.f32 %v352_v49, %v296_v50  ;;  %v297_v54 = vadd.f32 %v292_v52, %v182_v46  ;;  %v403_v55 = vpop.f32.mrb[7].mxu0 }
  0xfa   :  { %v307_v56 = vmax.f32 %v305_v53, 0.0  ;;  %v306_v57 = vadd.f32 %v352_v49, %v297_v54 }
  0xfc   :  { %v309_v58 = vpack.c.bf16 %v307_v56, %v307_v56  ;;  %v308_v59 = vmax.f32 %v306_v57, 0.0 }
  0xfe   :  { %312 = vst.msk [vmem:[%s526_s3] sm:$0xf] %vm311_vm5, %v309_v58  ;;  %v310_v60 = vpack.c.bf16 %v308_v59, %v308_v59 }
 0x100   :  { %313 = vst.msk [vmem:[%s526_s3 + $0x4] sm:$0xf] %vm311_vm5, %v310_v60 }

// kernel: _lambda_.10
= control target key start
LH: loop header
LB: loop body
LE: loop exit
PB: predicated region body
PF: predicated region fallthrough
CT: control target
= control target key end

     0   :  { %v430_v0 = vmov 0.0   ;;  %vm431_vm0 = vmmov 0   ;;  %vm27_vm1 = vsmask.f32 3328  ;;  %vm28_vm2 = vsmask.f32 7440  ;;  %s532_s1 = inlined_call_operand.vmem [shape: bf16[3,64,64], index: 1, kind: input, shape index: {}]   ;;  %s533_s0 = inlined_call_operand.vmem [shape: bf16[2,1,10,64], index: 0, kind: input, shape index: {}]   ;;  %s534_s2 = inlined_call_operand.vmem [shape: f32[1,64], index: 2, kind: input, shape index: {}]   ;;  %s535_s3 = inlined_call_operand.vmem [shape: bf16[2,8,64], index: 3, kind: output, shape index: {}]  }
   0x1   :  { %379 = vmatprep.subr.bf16.mxu0 %v430_v0  ;;  %391 = vmatprep.subr.bf16.mxu1 %v430_v0  ;;  %v417_v1 = vld [vmem:[%s532_s1 + $0x20] sm:$0xff]   ;;  %v419_v3 = vld [vmem:[%s532_s1 + $0x28] sm:$0xff]   ;;  %v421_v5 = vld [vmem:[%s532_s1 + $0x30] sm:$0xff]   ;;  %vm94_vm4 = vcmask 523264   ;;  %vm214_vm5 = vcmask 1042432   ;;  %vm215_vm6 = vcmask 1046532  }
   0x2   :  { %v418_v2 = vld [vmem:[%s532_s1] sm:$0xff]   ;;  %387 = vmatprep.mubr.msk.bf16.mxu0 %vm431_vm0, %v430_v0  ;;  %399 = vmatprep.mubr.msk.bf16.mxu1 %vm431_vm0, %v430_v0  ;;  %v420_v4 = vld [vmem:[%s532_s1 + $0x8] sm:$0xff]   ;;  %v422_v6 = vld [vmem:[%s532_s1 + $0x10] sm:$0xff]   ;;  %vm320_vm8 = vcmask 519168  }
   0x3   :  { %380 = vmatpush3.bf16.msra.mxu0 %v417_v1  ;;  %392 = vmatpush3.bf16.msra.mxu1 %v418_v2  ;;  %v15_v7 = vld [vmem:[%s533_s0] sm:$0xf]  ;;  %v16_v8 = vld [vmem:[%s533_s0 + $0x4] sm:$0x1]  ;;  %v17_v9 = vld [vmem:[%s533_s0 + $0x8] sm:$0xf] }
   0x4   :  { %381 = vmatprep.subr.bf16.mxu0 %v430_v0  ;;  %393 = vmatprep.subr.bf16.mxu1 %v430_v0  ;;  %v18_v10 = vld [vmem:[%s533_s0 + $0xc] sm:$0x1]  ;;  %v31_v11 = vshrl.u32 %v15_v7, 16  ;;  %v34_v12 = vshll.u32 %v15_v7, 16  ;;  %v40_v13 = vshll.u32 %v16_v8, 16  ;;  %v45_v14 = vshrl.u32 %v17_v9, 16  ;;  %vm29_vm3 = vmor %vm27_vm1, %vm28_vm2 }
   0x5   :  { %v423_v15 = vld [vmem:[%s532_s1 + $0x38] sm:$0xff]   ;;  %v48_v16 = vshll.u32 %v17_v9, 16  ;;  %v54_v17 = vshll.u32 %v18_v10, 16  ;;  %v341_v27 = vcombine.low %v15_v7, %v17_v9  ;;  %v426_v32 = vld [vmem:[%s532_s1 + $0x40] sm:$0xff]   ;;  %v427_v34 = vld [vmem:[%s532_s1 + $0x48] sm:$0xff]   ;;  %v219_v35 = vrot.slane %v16_v8, 5 }
   0x6   :  { %v424_v18 = vld [vmem:[%s532_s1 + $0x18] sm:$0xff]   ;;  %v33_v19 = vrot.slane %v31_v11, 4  ;;  %v36_v20 = vrot.slane %v34_v12, 5  ;;  %v47_v21 = vrot.slane %v45_v14, 4  ;;  %v42_v22 = vrot.slane %v40_v13, 5  ;;  %v428_v37 = vld [vmem:[%s532_s1 + $0x50] sm:$0xff]   ;;  %vm216_vm7 = vmor %vm214_vm5, %vm215_vm6 }
   0x7   :  { %382 = vmatpush3.bf16.msra.mxu0 %v419_v3  ;;  %394 = vmatpush3.bf16.msra.mxu1 %v420_v4  ;;  %v50_v23 = vrot.slane %v48_v16, 5  ;;  %v56_v26 = vrot.slane %v54_v17, 5  ;;  %v223_v36 = vrot.slane %v18_v10, 5  ;;  %v347_v38 = vrot.slane %v15_v7, 9  ;;  %v429_v40 = vld [vmem:[%s532_s1 + $0x58] sm:$0xff]  }
   0x8   :  { %383 = vmatprep.subr.bf16.mxu0 %v430_v0  ;;  %395 = vmatprep.subr.bf16.mxu1 %v430_v0  ;;  %v37_v24 = vor.u32 %v36_v20, %v33_v19  ;;  %v348_v39 = vrot.slane %v17_v9, 9  ;;  %v363_v55 = vld [vmem:[%s534_s2] ss:$0 sm:$0xff] }
   0x9   :  { %v51_v25 = vor.u32 %v50_v23, %v47_v21  ;;  %v220_v41 = vsel %vm216_vm7, %v347_v38, %v219_v35 }
   0xa   :  { %v38_v28 = vrot.slane %v37_v24, 4  ;;  %v224_v42 = vsel %vm216_vm7, %v348_v39, %v223_v36 }
   0xb   :  { %384 = vmatpush3.bf16.msra.mxu0 %v421_v5  ;;  %396 = vmatpush3.bf16.msra.mxu1 %v422_v6  ;;  %v52_v29 = vrot.slane %v51_v25, 4  ;;  %v357_v43 = vcombine.low %v220_v41, %v224_v42 }
   0xc   :  { %385 = vmatprep.subr.bf16.mxu0 %v430_v0  ;;  %397 = vmatprep.subr.bf16.mxu1 %v430_v0  ;;  %v43_v30 = vsel %vm29_vm3, %v38_v28, %v42_v22 }
   0xd   :  { %v57_v31 = vsel %vm29_vm3, %v52_v29, %v56_v26 }
   0xe   :  { %v335_v33 = vcombine.low %v43_v30, %v57_v31 }
   0xf   :  { %386 = vmatpush3.bf16.msra.mxu0 %v423_v15  ;;  %398 = vmatpush3.bf16.msra.mxu1 %v424_v18 }
  0x10   :  { %403 = vmatprep.subr.bf16.mxu0 %v430_v0 }
  0x12   :  { %400 = vmatmul.mubr.msk.bf16.vlgmr.msra.gmra.mrb[0].mxu1 %vm94_vm4, %v341_v27  ;;  %388 = vmatmul.mubr.msk.bf16.vlgmr.msra.gmra.mrb[0].mxu0 %vm94_vm4, %v335_v33 }
  0x13   :  { %404 = vmatpush3.bf16.msra.mxu0 %v426_v32  ;;  %411 = vmatprep.mubr.msk.bf16.mxu0 %vm431_vm0, %v430_v0 }
  0x14   :  { %405 = vmatprep.subr.bf16.mxu0 %v430_v0 }
  0x17   :  { %406 = vmatpush3.bf16.msra.mxu0 %v427_v34 }
  0x18   :  { %407 = vmatprep.subr.bf16.mxu0 %v430_v0 }
  0x1b   :  { %408 = vmatpush3.bf16.msra.mxu0 %v428_v37 }
  0x1c   :  { %409 = vmatprep.subr.bf16.mxu0 %v430_v0 }
  0x1f   :  { %410 = vmatpush3.bf16.msra.mxu0 %v429_v40 }
  0x22   :  { %412 = vmatmul.mubr.msk.bf16.vlgmr.msra.gmra.mrb[4].mxu0 %vm94_vm4, %v357_v43 }
  0xe5   :  { %v205_v44 = vpop.f32.mrb[0].mxu1  ;;  %v132_v47 = vpop.f32.mrb[0].mxu0 }
  0xe6   :  { %v401_v45 = vpop.f32.mrb[1].mxu1  ;;  %v206_v49 = vadd.f32 %v205_v44, %v132_v47  ;;  %v389_v50 = vpop.f32.mrb[1].mxu0 }
  0xe7   :  { %v208_v46 = vpop.f32.mrb[2].mxu1  ;;  %v135_v51 = vpop.f32.mrb[2].mxu0 }
  0xe8   :  { %v402_v48 = vpop.f32.mrb[3].mxu1  ;;  %v209_v52 = vadd.f32 %v208_v46, %v135_v51  ;;  %v390_v53 = vpop.f32.mrb[3].mxu0 }
  0xf5   :  { %v298_v54 = vpop.f32.mrb[4].mxu0 }
  0xf6   :  { %v305_v56 = vadd.f32 %v298_v54, %v206_v49  ;;  %v413_v57 = vpop.f32.mrb[5].mxu0 }
  0xf7   :  { %v301_v58 = vpop.f32.mrb[6].mxu0 }
  0xf8   :  { %v314_v59 = vadd.f32 %v363_v55, %v305_v56  ;;  %v306_v60 = vadd.f32 %v301_v58, %v209_v52  ;;  %v414_v61 = vpop.f32.mrb[7].mxu0 }
  0xfa   :  { %v316_v62 = vmax.f32 %v314_v59, 0.0  ;;  %v315_v63 = vadd.f32 %v363_v55, %v306_v60 }
  0xfc   :  { %v318_v0 = vpack.c.bf16 %v316_v62, %v316_v62  ;;  %v317_v1 = vmax.f32 %v315_v63, 0.0 }
  0xfe   :  { %321 = vst.msk [vmem:[%s535_s3] sm:$0xf] %vm320_vm8, %v318_v0  ;;  %v319_v2 = vpack.c.bf16 %v317_v1, %v317_v1 }
 0x100   :  { %322 = vst.msk [vmem:[%s535_s3 + $0x4] sm:$0xf] %vm320_vm8, %v319_v2 }

// kernel: _lambda_.11
= control target key start
LH: loop header
LB: loop body
LE: loop exit
PB: predicated region body
PF: predicated region fallthrough
CT: control target
= control target key end

     0   :  { %vm119_vm0 = vcmask 523264   ;;  %vm29_vm1 = vsmask.f32 3328  ;;  %vm30_vm2 = vsmask.f32 7440  ;;  %vm266_vm3 = vcmask 1042432   ;;  %s698_s1 = inlined_call_operand.vmem [shape: bf16[3,64,64], index: 1, kind: input, shape index: {}]   ;;  %s699_s0 = inlined_call_operand.vmem [shape: bf16[2,1,18,64], index: 0, kind: input, shape index: {}]   ;;  %s700_s2 = inlined_call_operand.vmem [shape: f32[1,64], index: 2, kind: input, shape index: {}]   ;;  %s701_s3 = inlined_call_operand.vmem [shape: f32[2,16,64], index: 3, kind: output, shape index: {}]  }
   0x1   :  { %v529_v0 = vld [vmem:[%s698_s1] sm:$0xff]   ;;  %v530_v1 = vld [vmem:[%s698_s1 + $0x8] sm:$0xff]   ;;  %v531_v2 = vld [vmem:[%s698_s1 + $0x10] sm:$0xff]   ;;  %vm267_vm4 = vcmask 1046532  }
   0x2   :  { %497 = vmatprep.subr.bf16.mxu0 %v529_v0  ;;  %v533_v3 = vld [vmem:[%s698_s1 + $0x20] sm:$0xff]   ;;  %v532_v9 = vld [vmem:[%s698_s1 + $0x18] sm:$0xff]   ;;  %v536_v12 = vld [vmem:[%s698_s1 + $0x28] sm:$0xff]  }
   0x3   :  { %498 = vmatpush3.bf16.msra.mxu0 %v529_v0  ;;  %v15_v4 = vld [vmem:[%s699_s0] sm:$0xf]  ;;  %v16_v5 = vld [vmem:[%s699_s0 + $0x4] sm:$0xf]  ;;  %485 = vmatprep.subr.bf16.mxu1 %v533_v3  ;;  %v607_v13 = vld [vmem:[%s699_s0 + $0xc] sm:$0xf] }
   0x4   :  { %499 = vmatprep.subr.bf16.mxu0 %v530_v1  ;;  %v33_v6 = vshrl.u32 %v15_v4, 16  ;;  %v440_v7 = vcombine.low %v15_v4, %v16_v5  ;;  %486 = vmatpush3.bf16.msra.mxu1 %v533_v3  ;;  %v271_v8 = vrot.slane %v16_v5, 5  ;;  %v36_v10 = vshll.u32 %v15_v4, 16  ;;  %v612_v15 = vld [vmem:[%s699_s0 + $0x10] sm:$0xf]  ;;  %v535_v18 = vld [vmem:[%s698_s1 + $0x40] sm:$0xff]   ;;  %vm625_vm5 = vmor %vm266_vm3, %vm267_vm4 }
   0x5   :  { %v46_v11 = vshrl.u32 %v16_v5, 16  ;;  %v448_v14 = vrot.slane %v15_v4, 9  ;;  %487 = vmatprep.subr.bf16.mxu1 %v536_v12  ;;  %v57_v19 = vshrl.u32 %v607_v13, 16  ;;  %v60_v20 = vshll.u32 %v607_v13, 16  ;;  %v539_v21 = vld [vmem:[%s698_s1 + $0x30] sm:$0xff]   ;;  %v541_v26 = vld [vmem:[%s698_s1 + $0x38] sm:$0xff]   ;;  %vm645_vm6 = vmor %vm29_vm1, %vm30_vm2 }
   0x6   :  { %505 = vmatprep.mubr.msk.bf16.mxu0 %vm119_vm0, %v440_v7  ;;  %v35_v16 = vrot.slane %v33_v6, 4  ;;  %v273_v17 = vrot.slane %v271_v8, 4  ;;  %v70_v22 = vshrl.u32 %v612_v15, 16  ;;  %v38_v23 = vrot.slane %v36_v10, 5  ;;  %v17_v27 = vld [vmem:[%s699_s0 + $0x8] sm:$0x1] }
   0x7   :  { %500 = vmatpush3.bf16.msra.mxu0 %v530_v1  ;;  %v441_v25 = vcombine.low %v607_v13, %v612_v15  ;;  %v42_v28 = vshll.u32 %v16_v5, 16  ;;  %v48_v30 = vrot.slane %v46_v11, 4  ;;  %v52_v31 = vshll.u32 %v17_v27, 16  ;;  %v20_v34 = vld [vmem:[%s699_s0 + $0x14] sm:$0x1]  ;;  %v538_v36 = vld [vmem:[%s698_s1 + $0x48] sm:$0xff]  }
   0x8   :  { %501 = vmatprep.subr.bf16.mxu0 %v531_v2  ;;  %488 = vmatpush3.bf16.msra.mxu1 %v536_v12  ;;  %v39_v29 = vor.u32 %v38_v23, %v35_v16  ;;  %v274_v32 = vrot.slane %v17_v27, 5  ;;  %v59_v35 = vrot.slane %v57_v19, 4  ;;  %v62_v39 = vrot.slane %v60_v20, 5  ;;  %v540_v53 = vld [vmem:[%s698_s1 + $0x50] sm:$0xff]   ;;  %v542_v0 = vld [vmem:[%s698_s1 + $0x58] sm:$0xff]  }
   0x9   :  { %489 = vmatprep.subr.bf16.mxu1 %v539_v21  ;;  %v44_v33 = vrot.slane %v42_v28, 5  ;;  %v66_v40 = vshll.u32 %v612_v15, 16  ;;  %v272_v41 = vsel %vm625_vm5, %v448_v14, %v271_v8  ;;  %v54_v43 = vrot.slane %v52_v31, 5  ;;  %v466_v11 = vld [vmem:[%s700_s2] ss:$0 sm:$0xff] }
   0xa   :  { %v40_v38 = vrot.slane %v39_v29, 4  ;;  %v72_v44 = vrot.slane %v70_v22, 4  ;;  %v76_v45 = vshll.u32 %v20_v34, 16  ;;  %v63_v46 = vor.u32 %v62_v39, %v59_v35 }
   0xb   :  { %502 = vmatpush3.bf16.msra.mxu0 %v531_v2  ;;  %v49_v42 = vor.u32 %v48_v30, %v44_v33  ;;  %v68_v47 = vrot.slane %v66_v40, 5  ;;  %v275_v48 = vsel %vm625_vm5, %v273_v17, %v274_v32  ;;  %v278_v49 = vrot.slane %v612_v15, 5 }
   0xc   :  { %503 = vmatprep.subr.bf16.mxu0 %v532_v9  ;;  %490 = vmatpush3.bf16.msra.mxu1 %v539_v21  ;;  %v45_v50 = vsel %vm645_vm6, %v40_v38, %v44_v33  ;;  %v458_v52 = vcombine.low %v272_v41, %v275_v48  ;;  %v64_v54 = vrot.slane %v63_v46, 4  ;;  %v78_v56 = vrot.slane %v76_v45, 5 }
   0xd   :  { %491 = vmatprep.subr.bf16.mxu1 %v541_v26  ;;  %v50_v51 = vrot.slane %v49_v42, 4  ;;  %v73_v55 = vor.u32 %v72_v44, %v68_v47  ;;  %v449_v61 = vrot.slane %v607_v13, 9  ;;  %v281_v62 = vrot.slane %v20_v34, 5 }
   0xe   :  { %v69_v59 = vsel %vm645_vm6, %v64_v54, %v68_v47  ;;  %v280_v63 = vrot.slane %v278_v49, 4 }
   0xf   :  { %504 = vmatpush3.bf16.msra.mxu0 %v532_v9  ;;  %v55_v57 = vsel %vm645_vm6, %v50_v51, %v54_v43  ;;  %v74_v60 = vrot.slane %v73_v55, 4  ;;  %v279_v3 = vsel %vm625_vm5, %v449_v61, %v278_v49 }
  0x10   :  { %509 = vmatprep.subr.bf16.mxu0 %v535_v18  ;;  %492 = vmatpush3.bf16.msra.mxu1 %v541_v26  ;;  %v432_v58 = vcombine.low %v45_v50, %v55_v57  ;;  %v282_v4 = vsel %vm625_vm5, %v280_v63, %v281_v62 }
  0x11   :  { %v79_v1 = vsel %vm645_vm6, %v74_v60, %v78_v56  ;;  %v459_v5 = vcombine.low %v279_v3, %v282_v4 }
  0x12   :  { %506 = vmatmul.mubr.msk.bf16.vlgmr.msra.gmra.mrb[0].mxu0 %vm119_vm0, %v441_v25  ;;  %493 = vmatprep.mubr.msk.bf16.mxu1 %vm119_vm0, %v432_v58  ;;  %v433_v2 = vcombine.low %v69_v59, %v79_v1 }
  0x13   :  { %510 = vmatpush3.bf16.msra.mxu0 %v535_v18  ;;  %517 = vmatprep.mubr.msk.bf16.mxu0 %vm119_vm0, %v458_v52 }
  0x14   :  { %511 = vmatprep.subr.bf16.mxu0 %v538_v36  ;;  %494 = vmatmul.mubr.msk.bf16.vlgmr.msra.gmra.mrb[0].mxu1 %vm119_vm0, %v433_v2 }
  0x17   :  { %512 = vmatpush3.bf16.msra.mxu0 %v538_v36 }
  0x18   :  { %513 = vmatprep.subr.bf16.mxu0 %v540_v53 }
  0x1b   :  { %514 = vmatpush3.bf16.msra.mxu0 %v540_v53 }
  0x1c   :  { %515 = vmatprep.subr.bf16.mxu0 %v542_v0 }
  0x1f   :  { %516 = vmatpush3.bf16.msra.mxu0 %v542_v0 }
  0x22   :  { %518 = vmatmul.mubr.msk.bf16.vlgmr.msra.gmra.mrb[0].mxu0 %vm119_vm0, %v459_v5 }
  0xe7   :  { %v495_v6 = vpop.f32.mrb[0].mxu1 }
  0xe8   :  { %v160_v7 = vpop.f32.mrb[1].mxu1 }
  0xe9   :  { %v496_v8 = vpop.f32.mrb[2].mxu1 }
  0xea   :  { %v163_v9 = vpop.f32.mrb[3].mxu1 }
  0xf5   :  { %v519_v10 = vpop.f32.mrb[0].mxu0 }
  0xf6   :  { %v521_v12 = vadd.f32 %v519_v10, %v495_v6  ;;  %v362_v13 = vpop.f32.mrb[1].mxu0 }
  0xf7   :  { %v522_v14 = vadd.f32 %v362_v13, %v160_v7  ;;  %v520_v15 = vpop.f32.mrb[2].mxu0 }
  0xf8   :  { %v390_v16 = vadd.f32 %v521_v12, %v466_v11  ;;  %v523_v17 = vadd.f32 %v520_v15, %v496_v8  ;;  %v365_v18 = vpop.f32.mrb[3].mxu0 }
  0xf9   :  { %v388_v19 = vadd.f32 %v522_v14, %v466_v11  ;;  %v524_v20 = vadd.f32 %v365_v18, %v163_v9 }
  0xfa   :  { %v394_v21 = vsub.f32 0.0, %v390_v16  ;;  %v391_v22 = vadd.f32 %v523_v17, %v466_v11 }
  0xfb   :  { %v392_v23 = vsub.f32 0.0, %v388_v19  ;;  %v389_v24 = vadd.f32 %v524_v20, %v466_v11 }
  0xfc   :  { %v400_v25 = vmul.f32 1.442695, %v394_v21  ;;  %v395_v26 = vsub.f32 0.0, %v391_v22 }
  0xfd   :  { %v396_v27 = vmul.f32 1.442695, %v392_v23  ;;  %v393_v28 = vsub.f32 0.0, %v389_v24 }
  0xfe   :  { %543 = vpow2.f32 %v400_v25  ;;  %v402_v29 = vmul.f32 1.442695, %v395_v26 }
  0xff   :  { %545 = vpow2.f32 %v396_v27  ;;  %v398_v30 = vmul.f32 1.442695, %v393_v28 }
 0x100   :  { %547 = vpow2.f32 %v402_v29 }
 0x101   :  { %549 = vpow2.f32 %v398_v30 }
 0x108   :  { %v544_v31 = vpop.eup %543 }
 0x109   :  { %v546_v32 = vpop.eup %545  ;;  %v406_v33 = vadd.f32 1.0, %v544_v31 }
 0x10a   :  { %v548_v34 = vpop.eup %547  ;;  %v404_v35 = vadd.f32 1.0, %v546_v32 }
 0x10b   :  { %v550_v36 = vpop.eup %549  ;;  %551 = vrcp.f32 %v406_v33  ;;  %v407_v37 = vadd.f32 1.0, %v548_v34 }
 0x10c   :  { %553 = vrcp.f32 %v404_v35  ;;  %v405_v38 = vadd.f32 1.0, %v550_v36 }
 0x10d   :  { %555 = vrcp.f32 %v407_v37 }
 0x10e   :  { %557 = vrcp.f32 %v405_v38 }
 0x115   :  { %v552_v39 = vpop.eup %551 }
 0x116   :  { %v554_v40 = vpop.eup %553  ;;  %418 = vst.msk [vmem:[%s701_s3 + $0x10] sm:$0xff] %vm119_vm0, %v552_v39 }
 0x117   :  { %v556_v41 = vpop.eup %555  ;;  %416 = vst.msk [vmem:[%s701_s3] sm:$0xff] %vm119_vm0, %v554_v40 }
 0x118   :  { %v558_v42 = vpop.eup %557  ;;  %419 = vst.msk [vmem:[%s701_s3 + $0x18] sm:$0xff] %vm119_vm0, %v556_v41 }
 0x119   :  { %417 = vst.msk [vmem:[%s701_s3 + $0x8] sm:$0xff] %vm119_vm0, %v558_v42 }

</bundles_post_ra>
